<compile_context>
chip_gen: v6e
topology: v6e:2x2x1
jax: 0.10.0
libtpu: 0.0.40
codegen_flags: <defaults>
</compile_context>

<pallas_src>
import jax
import jax.numpy as jnp
from jax.experimental import pallas as pl
from jax.experimental.pallas import tpu as pltpu


def _leaky_relu(x, slope=0.2):
    return jnp.where(x > 0, x, slope * x)


def _round_up(x, m):
    return (x + m - 1) // m * m


def _tk_max_for_device():
    """Per-generation cap on the K tile (keeps double-buffered W1 in VMEM)."""
    try:
        kind = jax.devices()[0].device_kind.lower()
    except Exception:
        kind = ""
    if "v6" in kind or "v7" in kind:
        return 8192          # ~16 MiB double-buffered bf16 W1 tile
    return 4096              # v5e (16 MiB scoped default) / unknown


def discriminator_kernel(x_ref, w1_ref, b1_ref, w2_ref, b2_ref,
                         w3_ref, b3_ref, o_ref, acc_ref):
    k = pl.program_id(1)

    @pl.when(k == 0)
    def _():
        acc_ref[...] = jnp.zeros_like(acc_ref)

    # Partial first-layer matmul for this K tile (bf16 inputs, f32 accumulate).
    acc_ref[...] += jnp.dot(x_ref[...], w1_ref[...],
                            preferred_element_type=jnp.float32)

    @pl.when(k == pl.num_programs(1) - 1)
    def _():
        # Layer 1 epilogue.
        h1 = _leaky_relu(acc_ref[...] + b1_ref[...])
        # Layer 2 on the MXU (bf16 inputs, f32 accumulate).
        h2 = jnp.dot(h1.astype(w2_ref.dtype), w2_ref[...],
                     preferred_element_type=jnp.float32) + b2_ref[...]
        h2 = _leaky_relu(h2)
        # Layer 3 (256 -> 1) on VPU/XLU: elementwise mul + lane reduction.
        logits = jnp.sum(h2 * w3_ref[...], axis=-1, keepdims=True) + b3_ref[...]
        # Exact sigmoid (tiny (tile_B, 1) tensor; EUP exp + true divide).
        o_ref[...] = 1.0 / (1.0 + jnp.exp(-logits))


def prepare_params(params, *, d_in):
    """One-time pre-cast / pre-pad of the weights (hoisted out of forward)."""
    w1, b1, w2, b2, w3, b3 = params
    h1 = w1.shape[1]
    h2 = w2.shape[1]
    d_pad = _round_up(max(d_in, 256), 256)
    w1_p = jnp.zeros((d_pad, h1), jnp.bfloat16).at[:d_in, :].set(
        w1.astype(jnp.bfloat16))
    return {
        "w1": w1_p,                                      # (D_pad, 512) bf16
        "b1": b1.reshape(1, h1).astype(jnp.float32),
        "w2": w2.astype(jnp.bfloat16),                   # (512, 256) bf16
        "b2": b2.reshape(1, h2).astype(jnp.float32),
        "w3": w3.reshape(1, h2).astype(jnp.float32),
        "b3": b3.reshape(1, 1).astype(jnp.float32),
        "d_in": d_in,
        "d_pad": d_pad,
    }


def discriminator_forward(image, text_embedding, prepared, *,
                          tk_max=None, tile_b=128):
    """Equivalent of Discriminator.forward(image, text_embedding)."""
    B = image.shape[0]
    x = jnp.concatenate(
        [image.reshape(B, -1).astype(jnp.float32),
         text_embedding.astype(jnp.float32)], axis=1)

    d_in, d_pad = prepared["d_in"], prepared["d_pad"]
    assert x.shape[1] == d_in, (x.shape, d_in)
    H1 = prepared["w1"].shape[1]
    H2 = prepared["w2"].shape[1]

    # Batch padded to a multiple of 16 (bf16 sublane packing), then tiled.
    B_pad = max(16, _round_up(B, 16))
    tb = min(tile_b, B_pad)
    B_pad = _round_up(B_pad, tb)
    b_steps = B_pad // tb

    # K tile: largest 256-multiple divisor of D_pad within the chip budget.
    if tk_max is None:
        tk_max = _tk_max_for_device()
    tk = 256
    cand = 256
    while cand <= min(tk_max, d_pad):
        if d_pad % cand == 0:
            tk = cand
        cand += 256
    k_steps = d_pad // tk

    # Per-call activation padding (weights were prepared once at init).
    x_p = jnp.zeros((B_pad, d_pad), jnp.bfloat16).at[:B, :d_in].set(
        x.astype(jnp.bfloat16))

    # Advisory cost estimate (memory-bound on streaming W1).
    bytes_accessed = (B_pad * d_pad * 2 + d_pad * H1 * 2 + H1 * H2 * 2
                      + (H1 + 2 * H2 + 1) * 4 + B_pad * 4)
    flops = 2 * B_pad * d_pad * H1 + 2 * B_pad * H1 * H2 + 2 * B_pad * H2
    cost = pl.CostEstimate(flops=flops, transcendentals=B_pad,
                           bytes_accessed=bytes_accessed)

    # VMEM budget: double-buffered W1/x tiles + accumulator + residents.
    vmem_need = (2 * tk * H1 * 2 + 2 * tb * tk * 2 + tb * H1 * 4
                 + 2 * (H1 * 4 + H1 * H2 * 2 + 2 * H2 * 4 + 4)
                 + 2 * tb * 128 * 4)
    vmem_limit = min(max(int(vmem_need * 1.25) + (4 << 20), 32 << 20), 48 << 20)

    out = pl.pallas_call(
        discriminator_kernel,
        out_shape=jax.ShapeDtypeStruct((B_pad, 1), jnp.float32),
        grid_spec=pltpu.PrefetchScalarGridSpec(
            num_scalar_prefetch=0,
            grid=(b_steps, k_steps),
            in_specs=[
                pl.BlockSpec((tb, tk), lambda b, k: (b, k)),    # x tile
                pl.BlockSpec((tk, H1), lambda b, k: (k, 0)),    # W1 tile (streamed)
                pl.BlockSpec((1, H1), lambda b, k: (0, 0)),     # b1 (resident)
                pl.BlockSpec((H1, H2), lambda b, k: (0, 0)),    # W2 (resident)
                pl.BlockSpec((1, H2), lambda b, k: (0, 0)),     # b2 (resident)
                pl.BlockSpec((1, H2), lambda b, k: (0, 0)),     # w3 row (resident)
                pl.BlockSpec((1, 1), lambda b, k: (0, 0)),      # b3 (resident)
            ],
            out_specs=pl.BlockSpec((tb, 1), lambda b, k: (b, 0)),
            scratch_shapes=[pltpu.VMEM((tb, H1), jnp.float32)],
        ),
        compiler_params=pltpu.CompilerParams(
            dimension_semantics=("parallel", "arbitrary"),
            vmem_limit_bytes=vmem_limit),
        cost_estimate=cost,
    )(x_p, prepared["w1"], prepared["b1"], prepared["w2"], prepared["b2"],
      prepared["w3"], prepared["b3"])
    return out[:B]


def init_params(key, text_dim, image_size):
    """Deterministic init matching nn.Linear default (U(-1/sqrt(fan_in), +))."""
    d_in = text_dim + image_size * image_size * 3
    dims = [(d_in, 512), (512, 256), (256, 1)]
    params = []
    for (fin, fout) in dims:
        key, kw, kb = jax.random.split(key, 3)
        bound = 1.0 / (fin ** 0.5)
        w = jax.random.uniform(kw, (fin, fout), jnp.float32, -bound, bound)
        b = jax.random.uniform(kb, (1, fout), jnp.float32, -bound, bound)
        params += [w, b]
    return tuple(params)


def reference_forward_bf16(image, text_embedding, params):
    """Pure-JAX reference mirroring the kernel's bf16/f32 mixed precision."""
    w1, b1, w2, b2, w3, b3 = params
    x = jnp.concatenate([image.reshape(image.shape[0], -1), text_embedding], 1)
    h1 = jnp.dot(x.astype(jnp.bfloat16), w1.astype(jnp.bfloat16),
                 preferred_element_type=jnp.float32) + b1
    h1 = _leaky_relu(h1)
    h2 = jnp.dot(h1.astype(jnp.bfloat16), w2.astype(jnp.bfloat16),
                 preferred_element_type=jnp.float32) + b2
    h2 = _leaky_relu(h2)
    return jax.nn.sigmoid(h2 @ w3 + b3)


def reference_forward_f32(image, text_embedding, params):
    """Pure-f32 reference mirroring the PyTorch module exactly."""
    w1, b1, w2, b2, w3, b3 = params
    x = jnp.concatenate([image.reshape(image.shape[0], -1), text_embedding], 1)
    h = _leaky_relu(x @ w1 + b1)
    h = _leaky_relu(h @ w2 + b2)
    return jax.nn.sigmoid(h @ w3 + b3)


if __name__ == "__main__":
    # Small shapes consistent with the module's forward:
    # image (B, 3, S, S), text_embedding (B, text_dim)
    B, S, TEXT_DIM = 2, 16, 32

    key = jax.random.PRNGKey(0)
    k_img, k_txt, k_par = jax.random.split(key, 3)
    image = jax.random.normal(k_img, (B, 3, S, S), jnp.float32)
    text_embedding = jax.random.normal(k_txt, (B, TEXT_DIM), jnp.float32)
    params = init_params(k_par, TEXT_DIM, S)

    d_in = TEXT_DIM + 3 * S * S            # 800 -> D_pad = 1024
    prepared = prepare_params(params, d_in=d_in)

    # 1) Default path: auto tk (single K step at this tiny D_in).
    out = discriminator_forward(image, text_embedding, prepared)
    out = jax.block_until_ready(out)
    assert out.shape == (B, 1)

    # 2) Force multiple K steps (tk=256 -> 4 tiles) and multiple batch tiles
    #    (B=20 -> B_pad=32, tile_b=16 -> 2 parallel batch tiles).
    B2 = 20
    k_i2, k_t2 = jax.random.split(jax.random.PRNGKey(1))
    image2 = jax.random.normal(k_i2, (B2, 3, S, S), jnp.float32)
    text2 = jax.random.normal(k_t2, (B2, TEXT_DIM), jnp.float32)
    out2 = discriminator_forward(image2, text2, prepared, tk_max=256, tile_b=16)
    out2 = jax.block_until_ready(out2)
    assert out2.shape == (B2, 1)

    for (o, img, txt) in ((out, image, text_embedding), (out2, image2, text2)):
        ref_mixed = reference_forward_bf16(img, txt, params)
        assert jnp.allclose(o, ref_mixed, atol=5e-3, rtol=5e-3), (
            float(jnp.max(jnp.abs(o - ref_mixed))))
        ref_f32 = reference_forward_f32(img, txt, params)
        assert jnp.allclose(o, ref_f32, atol=5e-2, rtol=5e-2), (
            float(jnp.max(jnp.abs(o - ref_f32))))

    print("KERNEL_OK")
</pallas_src>

<mosaic_0001>
module attributes {stable_mosaic.version = 11 : i64} {
  func.func @discriminator_kernel(%arg0: i32, %arg1: i32, %arg2: memref<16x1024xbf16, #tpu.memory_space<vmem>>, %arg3: memref<1024x512xbf16, #tpu.memory_space<vmem>>, %arg4: memref<1x512xf32, #tpu.memory_space<vmem>>, %arg5: memref<512x256xbf16, #tpu.memory_space<vmem>>, %arg6: memref<1x256xf32, #tpu.memory_space<vmem>>, %arg7: memref<1x256xf32, #tpu.memory_space<vmem>>, %arg8: memref<1x1xf32, #tpu.memory_space<vmem>>, %arg9: memref<16x1xf32, #tpu.memory_space<vmem>>, %arg10: memref<16x512xf32, #tpu.memory_space<vmem>>) attributes {dimension_semantics = [#tpu.dimension_semantics<parallel>, #tpu.dimension_semantics<arbitrary>], iteration_bounds = array<i64: 1, 1>, scalar_prefetch = 0 : i64, scratch_operands = 1 : i64, tpu.core_type = #tpu.core_type<tc>, window_params = [{transform_indices = @transform_0, window_bounds = array<i64: 16, 1024>}, {transform_indices = @transform_1, window_bounds = array<i64: 1024, 512>}, {pipeline_mode = #tpu.pipeline_mode<synchronous>, transform_indices = @transform_2, window_bounds = array<i64: 1, 512>}, {pipeline_mode = #tpu.pipeline_mode<synchronous>, transform_indices = @transform_3, window_bounds = array<i64: 512, 256>}, {pipeline_mode = #tpu.pipeline_mode<synchronous>, transform_indices = @transform_4, window_bounds = array<i64: 1, 256>}, {pipeline_mode = #tpu.pipeline_mode<synchronous>, transform_indices = @transform_5, window_bounds = array<i64: 1, 256>}, {pipeline_mode = #tpu.pipeline_mode<synchronous>, transform_indices = @transform_6, window_bounds = array<i64: 1, 1>}, {transform_indices = @transform_7, window_bounds = array<i64: 16, 1>}]} {
    %c0_i32 = arith.constant 0 : i32
    %0 = arith.cmpi eq, %arg1, %c0_i32 : i32
    %1 = arith.extui %0 : i1 to i32
    %c0_i32_0 = arith.constant 0 : i32
    %2 = arith.cmpi ne, %1, %c0_i32_0 : i32
    scf.if %2 {
      %cst_10 = arith.constant 0.000000e+00 : f32
      %12 = vector.broadcast %cst_10 : f32 to vector<16x512xf32>
      %c0_11 = arith.constant 0 : index
      %c0_12 = arith.constant 0 : index
      %13 = vector.load %arg10[%c0_11, %c0_12] : memref<16x512xf32, #tpu.memory_space<vmem>>, vector<16x512xf32>
      tpu.vector_store %arg10[%c0_11, %c0_12], %12 {strides = array<i32>} : memref<16x512xf32, #tpu.memory_space<vmem>>, vector<16x512xf32>,
    } else {
    }
    %c0 = arith.constant 0 : index
    %c0_1 = arith.constant 0 : index
    %3 = vector.load %arg10[%c0, %c0_1] : memref<16x512xf32, #tpu.memory_space<vmem>>, vector<16x512xf32>
    %c0_2 = arith.constant 0 : index
    %c0_3 = arith.constant 0 : index
    %4 = vector.load %arg2[%c0_2, %c0_3] : memref<16x1024xbf16, #tpu.memory_space<vmem>>, vector<16x1024xbf16>
    %c0_4 = arith.constant 0 : index
    %c0_5 = arith.constant 0 : index
    %5 = vector.load %arg3[%c0_4, %c0_5] : memref<1024x512xbf16, #tpu.memory_space<vmem>>, vector<1024x512xbf16>
    %cst = arith.constant dense<0.000000e+00> : vector<16x512xf32>
    %6 = tpu.matmul %4, %5, %cst {dimension_numbers = #tpu.dot_dimension_numbers<[1], [0], [0], [1], [0, 0, 1, 1], [], []>} : vector<16x1024xbf16>, vector<1024x512xbf16>, vector<16x512xf32> -> vector<16x512xf32>
    %7 = arith.addf %3, %6 : vector<16x512xf32>
    %c0_6 = arith.constant 0 : index
    %c0_7 = arith.constant 0 : index
    %8 = vector.load %arg10[%c0_6, %c0_7] : memref<16x512xf32, #tpu.memory_space<vmem>>, vector<16x512xf32>
    tpu.vector_store %arg10[%c0_6, %c0_7], %7 {strides = array<i32>} : memref<16x512xf32, #tpu.memory_space<vmem>>, vector<16x512xf32>,
    %c0_i32_8 = arith.constant 0 : i32
    %9 = arith.cmpi eq, %arg1, %c0_i32_8 : i32
    %10 = arith.extui %9 : i1 to i32
    %c0_i32_9 = arith.constant 0 : i32
    %11 = arith.cmpi ne, %10, %c0_i32_9 : i32
    scf.if %11 {
      %c0_10 = arith.constant 0 : index
      %c0_11 = arith.constant 0 : index
      %12 = vector.load %arg10[%c0_10, %c0_11] : memref<16x512xf32, #tpu.memory_space<vmem>>, vector<16x512xf32>
      %c0_12 = arith.constant 0 : index
      %c0_13 = arith.constant 0 : index
      %13 = vector.load %arg4[%c0_12, %c0_13] : memref<1x512xf32, #tpu.memory_space<vmem>>, vector<1x512xf32>
      %14 = vector.broadcast %13 : vector<1x512xf32> to vector<16x512xf32>
      %15 = arith.addf %12, %14 : vector<16x512xf32>
      %cst_14 = arith.constant 0.000000e+00 : f32
      %16 = vector.broadcast %cst_14 : f32 to vector<16x512xf32>
      %17 = arith.cmpf ogt, %15, %16 : vector<16x512xf32>
      %cst_15 = arith.constant 2.000000e-01 : f32
      %18 = vector.broadcast %cst_15 : f32 to vector<16x512xf32>
      %19 = arith.mulf %18, %15 : vector<16x512xf32>
      %20 = arith.select %17, %15, %19 : vector<16x512xi1>, vector<16x512xf32>
      %21 = arith.truncf %20 : vector<16x512xf32> to vector<16x512xbf16>
      %c0_16 = arith.constant 0 : index
      %c0_17 = arith.constant 0 : index
      %22 = vector.load %arg5[%c0_16, %c0_17] : memref<512x256xbf16, #tpu.memory_space<vmem>>, vector<512x256xbf16>
      %cst_18 = arith.constant dense<0.000000e+00> : vector<16x256xf32>
      %23 = tpu.matmul %21, %22, %cst_18 {dimension_numbers = #tpu.dot_dimension_numbers<[1], [0], [0], [1], [0, 0, 1, 1], [], []>} : vector<16x512xbf16>, vector<512x256xbf16>, vector<16x256xf32> -> vector<16x256xf32>
      %c0_19 = arith.constant 0 : index
      %c0_20 = arith.constant 0 : index
      %24 = vector.load %arg6[%c0_19, %c0_20] : memref<1x256xf32, #tpu.memory_space<vmem>>, vector<1x256xf32>
      %25 = vector.broadcast %24 : vector<1x256xf32> to vector<16x256xf32>
      %26 = arith.addf %23, %25 : vector<16x256xf32>
      %cst_21 = arith.constant 0.000000e+00 : f32
      %27 = vector.broadcast %cst_21 : f32 to vector<16x256xf32>
      %28 = arith.cmpf ogt, %26, %27 : vector<16x256xf32>
      %cst_22 = arith.constant 2.000000e-01 : f32
      %29 = vector.broadcast %cst_22 : f32 to vector<16x256xf32>
      %30 = arith.mulf %29, %26 : vector<16x256xf32>
      %31 = arith.select %28, %26, %30 : vector<16x256xi1>, vector<16x256xf32>
      %c0_23 = arith.constant 0 : index
      %c0_24 = arith.constant 0 : index
      %32 = vector.load %arg7[%c0_23, %c0_24] : memref<1x256xf32, #tpu.memory_space<vmem>>, vector<1x256xf32>
      %33 = vector.broadcast %32 : vector<1x256xf32> to vector<16x256xf32>
      %34 = arith.mulf %31, %33 : vector<16x256xf32>
      %cst_25 = arith.constant dense<0.000000e+00> : vector<16xf32>
      %35 = vector.multi_reduction <add>, %34, %cst_25 [1] : vector<16x256xf32> to vector<16xf32>
      %36 = vector.shape_cast %35 : vector<16xf32> to vector<16x1xf32>
      %c0_26 = arith.constant 0 : index
      %c0_27 = arith.constant 0 : index
      %37 = vector.load %arg8[%c0_26, %c0_27] : memref<1x1xf32, #tpu.memory_space<vmem>>, vector<1x1xf32>
      %38 = vector.broadcast %37 : vector<1x1xf32> to vector<16x1xf32>
      %39 = arith.addf %36, %38 : vector<16x1xf32>
      %cst_28 = arith.constant 0.000000e+00 : f32
      %40 = vector.broadcast %cst_28 : f32 to vector<16x1xf32>
      %41 = arith.subf %40, %39 : vector<16x1xf32>
      %42 = math.exp %41 : vector<16x1xf32>
      %cst_29 = arith.constant 1.000000e+00 : f32
      %43 = vector.broadcast %cst_29 : f32 to vector<16x1xf32>
      %44 = arith.addf %43, %42 : vector<16x1xf32>
      %cst_30 = arith.constant 1.000000e+00 : f32
      %45 = vector.broadcast %cst_30 : f32 to vector<16x1xf32>
      %46 = arith.divf %45, %44 : vector<16x1xf32>
      %c0_31 = arith.constant 0 : index
      %c0_32 = arith.constant 0 : index
      %47 = vector.load %arg9[%c0_31, %c0_32] : memref<16x1xf32, #tpu.memory_space<vmem>>, vector<16x1xf32>
      tpu.vector_store %arg9[%c0_31, %c0_32], %46 {strides = array<i32>} : memref<16x1xf32, #tpu.memory_space<vmem>>, vector<16x1xf32>,
    } else {
    }
    return
  }
  func.func @transform_0(%arg0: i32, %arg1: i32) -> (i32, i32) {
    %c0_i32 = arith.constant 0 : i32
    return %arg0, %arg1 : i32, i32
  }
  func.func @transform_1(%arg0: i32, %arg1: i32) -> (i32, i32) {
    %c0_i32 = arith.constant 0 : i32
    %c0_i32_0 = arith.constant 0 : i32
    return %arg1, %c0_i32 : i32, i32
  }
  func.func @transform_2(%arg0: i32, %arg1: i32) -> (i32, i32) {
    %c0_i32 = arith.constant 0 : i32
    %c0_i32_0 = arith.constant 0 : i32
    %c0_i32_1 = arith.constant 0 : i32
    return %c0_i32, %c0_i32_0 : i32, i32
  }
  func.func @transform_3(%arg0: i32, %arg1: i32) -> (i32, i32) {
    %c0_i32 = arith.constant 0 : i32
    %c0_i32_0 = arith.constant 0 : i32
    %c0_i32_1 = arith.constant 0 : i32
    return %c0_i32, %c0_i32_0 : i32, i32
  }
  func.func @transform_4(%arg0: i32, %arg1: i32) -> (i32, i32) {
    %c0_i32 = arith.constant 0 : i32
    %c0_i32_0 = arith.constant 0 : i32
    %c0_i32_1 = arith.constant 0 : i32
    return %c0_i32, %c0_i32_0 : i32, i32
  }
  func.func @transform_5(%arg0: i32, %arg1: i32) -> (i32, i32) {
    %c0_i32 = arith.constant 0 : i32
    %c0_i32_0 = arith.constant 0 : i32
    %c0_i32_1 = arith.constant 0 : i32
    return %c0_i32, %c0_i32_0 : i32, i32
  }
  func.func @transform_6(%arg0: i32, %arg1: i32) -> (i32, i32) {
    %c0_i32 = arith.constant 0 : i32
    %c0_i32_0 = arith.constant 0 : i32
    %c0_i32_1 = arith.constant 0 : i32
    return %c0_i32, %c0_i32_0 : i32, i32
  }
  func.func @transform_7(%arg0: i32, %arg1: i32) -> (i32, i32) {
    %c0_i32 = arith.constant 0 : i32
    %c0_i32_0 = arith.constant 0 : i32
    return %arg0, %c0_i32 : i32, i32
  }
}

</mosaic_0001>

<bundles_post_ra>
// kernel: tpu_custom_call.1
= control target key start
LH: loop header
LB: loop body
LE: loop exit
PB: predicated region body
PF: predicated region fallthrough
CT: control target
= control target key end

     0   :  { %s3684_s0 = inlined_call_operand.hbm [shape: bf16[16,1024], index: 0, kind: input, shape index: {}]   ;;  %s3685_s1 = inlined_call_operand.hbm [shape: bf16[1024,512], index: 1, kind: input, shape index: {}]   ;;  %s3686_s2 = inlined_call_operand.vmem [shape: f32[1,512], index: 2, kind: input, shape index: {}]   ;;  %s3687_s3 = inlined_call_operand.hbm [shape: bf16[512,256], index: 3, kind: input, shape index: {}]   ;;  %s3688_s4 = inlined_call_operand.vmem [shape: f32[1,256], index: 4, kind: input, shape index: {}]   ;;  %s3689_s5 = inlined_call_operand.vmem [shape: f32[1,256], index: 5, kind: input, shape index: {}]   ;;  %s3690_s6 = inlined_call_operand.<no memory space> [shape: f32[1,1], index: 6, kind: input, shape index: {}]   ;;  %s3691_s7 = inlined_call_operand.vmem [shape: f32[16,1], index: 7, kind: output, shape index: {}]  }
   0x1   :  { %v12_v0 = vstv %s3690_s6 }
   0x2   :  { %13 = vst [vmem:[#allocation3] sm:$0x1] %v12_v0 }
   0x3   :  { %14 = vsyncpa [#allocation5], 0 }
   0x4   :  { %15 = vsyncpa [#allocation7], 0  ;;  %s3538_s26 = smov [#allocation6]  }
   0x5   :  { %s33_s27 = sshll.u32 %s3538_s26, 4  ;;  %s34_s27 = int_to_ptr.vmem [resolvable:$true] %s33_s27 }
   0x6   :  { %s3482_s28 = scalar_lea.vmem %s34_s27, 32768  ;;  %p3487_p1 = scmp.lt.s32.totalorder %s34_s27, %s34_s27 }
   0x7   :  { %p3483_p0 = scmp.ne.s32.totalorder %s34_s27, %s3482_s28  ;;  %p3488_p2 = scmp.lt.s32.totalorder %s3482_s28, %s3482_s28 }
   0x9   :  { %p3489_p3 = por %p3488_p2, %p3487_p1 }
   0xb   :  { %p3490_p4 = pnand %p3489_p3, %p3483_p0 }
   0xd   :  { %3493 = shalt.err (!%p3490_p4)
}
   0xe   :  { %s3539_s29 = smov 256   ;;  %s3540_s30 = smov 16  }
   0xf   :  { %39 = dma.hbm_to_vmem [thread:$0]  %s3685_s1, 32768, %s34_s27, [#allocation7], %s3539_s29, %s3539_s29, %s3540_s30  }
  0x10   :  { %s3541_s6 = smov [#allocation4]  }
  0x11   :  { %s21_s10 = sshll.u32 %s3541_s6, 4  ;;  %s22_s10 = int_to_ptr.vmem [resolvable:$true] %s21_s10 }
  0x12   :  { %s3502_s11 = scalar_lea.vmem %s22_s10, 1024  ;;  %p3507_p6 = scmp.lt.s32.totalorder %s22_s10, %s22_s10 }
  0x13   :  { %p3503_p5 = scmp.ne.s32.totalorder %s22_s10, %s3502_s11  ;;  %p3508_p7 = scmp.lt.s32.totalorder %s3502_s11, %s3502_s11 }
  0x15   :  { %p3509_p8 = por %p3508_p7, %p3507_p6 }
  0x17   :  { %p3510_p9 = pnand %p3509_p8, %p3503_p5 }
  0x19   :  { %3513 = shalt.err (!%p3510_p9)
}
  0x1a   :  { %s3542_s12 = smov 512   ;;  %s3543_s13 = smov 32  }
  0x1b   :  { %27 = dma.hbm_to_vmem [thread:$0]  %s3684_s0, 1024, %s22_s10, [#allocation5], %s3542_s12, %s3542_s12, %s3543_s13  }
  0x1c   :  { %s3544_s16 = smov [#allocation8]  }
  0x1d   :  { %s47_s17 = sshll.u32 %s3544_s16, 4  ;;  %s48_s17 = int_to_ptr.vmem [resolvable:$true] %s47_s17 }
  0x1e   :  { %s3522_s1 = scalar_lea.vmem %s48_s17, 8192  ;;  %p3527_p11 = scmp.lt.s32.totalorder %s48_s17, %s48_s17 }
  0x1f   :  { %p3523_p10 = scmp.ne.s32.totalorder %s48_s17, %s3522_s1  ;;  %p3528_p12 = scmp.lt.s32.totalorder %s3522_s1, %s3522_s1 }
  0x21   :  { %p3529_p13 = por %p3528_p12, %p3527_p11 }
  0x23   :  { %p3530_p0 = pnand %p3529_p13, %p3523_p10 }
  0x25   :  { %3533 = shalt.err (!%p3530_p0)
}
  0x26   :  { %s3545_s18 = smov 128   ;;  %s3546_s19 = smov 8  }
  0x27   :  { %53 = dma.hbm_to_vmem [thread:$0]  %s3687_s3, 8192, %s48_s17, [#allocation7], %s3545_s18, %s3545_s18, %s3546_s19  }
  0x28   :  { %3534 = dma.done.wait [#allocation5], 1024  }
  0x29   :  { %3535 = vsyncadd [#allocation5], 4294966272 }
  0x2a   :  { %3536 = dma.done.wait [#allocation7], 40960  }
  0x2b   :  { %3537 = vsyncadd [#allocation7], 4294926336  ;;  %v2986_v1 = vld [vmem:[#allocation6 + $0xe4] ss:$16 sps:$4 sm:$0xff]   ;;  %v2990_v3 = vld [vmem:[#allocation6 + $0xe0] ss:$16 sps:$4 sm:$0xff]  }
  0x2c   :  { %v2988_v2 = vld [vmem:[#allocation6 + $0x2e4] ss:$16 sps:$4 sm:$0xff]   ;;  %1673 = vmatprep.subr.bf16.mxu0 %v2986_v1  ;;  %v2991_v4 = vld [vmem:[#allocation6 + $0x2e0] ss:$16 sps:$4 sm:$0xff]   ;;  %v90_v51 = vld [vmem:[#allocation4 + $0x8] sm:$0xff]  ;;  %vm2639_vm12 = vcmask 7168  }
  0x2d   :  { %1716 = vmatprep.subr.bf16.mxu1 %v2988_v2  ;;  %v2992_v5 = vld [vmem:[#allocation6 + $0xc4] ss:$16 sps:$4 sm:$0xff]   ;;  %1674 = vmatpush1.bf16.msra.mxu0 %v2990_v3  ;;  %v2996_v7 = vld [vmem:[#allocation6 + $0xc0] ss:$16 sps:$4 sm:$0xff]   ;;  %v94_v52 = vld [vmem:[#allocation4 + $0x28] sm:$0xff] }
  0x2e   :  { %1717 = vmatpush1.bf16.msra.mxu1 %v2991_v4  ;;  %v2994_v6 = vld [vmem:[#allocation6 + $0x2c4] ss:$16 sps:$4 sm:$0xff]   ;;  %1675 = vmatprep.subr.bf16.mxu0 %v2992_v5  ;;  %v2997_v8 = vld [vmem:[#allocation6 + $0x2c0] ss:$16 sps:$4 sm:$0xff]   ;;  %v3601_v56 = vcombine.high %v90_v51, %v94_v52 }
  0x2f   :  { %1718 = vmatprep.subr.bf16.mxu1 %v2994_v6  ;;  %v2998_v9 = vld [vmem:[#allocation6 + $0xa4] ss:$16 sps:$4 sm:$0xff]   ;;  %v3002_v11 = vld [vmem:[#allocation6 + $0xa0] ss:$16 sps:$4 sm:$0xff]  }
  0x30   :  { %v3000_v10 = vld [vmem:[#allocation6 + $0x2a4] ss:$16 sps:$4 sm:$0xff]   ;;  %v3003_v12 = vld [vmem:[#allocation6 + $0x2a0] ss:$16 sps:$4 sm:$0xff]   ;;  %1748 = vmatprep.mubr.bf16.mxu1 %v3601_v56 }
  0x31   :  { %1676 = vmatpush1.bf16.msra.mxu0 %v2996_v7  ;;  %v3004_v13 = vld [vmem:[#allocation6 + $0x84] ss:$16 sps:$4 sm:$0xff]   ;;  %v3008_v15 = vld [vmem:[#allocation6 + $0x80] ss:$16 sps:$4 sm:$0xff]  }
  0x32   :  { %1719 = vmatpush1.bf16.msra.mxu1 %v2997_v8  ;;  %1677 = vmatprep.subr.bf16.mxu0 %v2998_v9  ;;  %v3006_v14 = vld [vmem:[#allocation6 + $0x284] ss:$16 sps:$4 sm:$0xff]   ;;  %v3009_v16 = vld [vmem:[#allocation6 + $0x280] ss:$16 sps:$4 sm:$0xff]  }
  0x33   :  { %1720 = vmatprep.subr.bf16.mxu1 %v3000_v10  ;;  %v3010_v17 = vld [vmem:[#allocation6 + $0x64] ss:$16 sps:$4 sm:$0xff]   ;;  %v3014_v19 = vld [vmem:[#allocation6 + $0x60] ss:$16 sps:$4 sm:$0xff]   ;;  %v3607_v10 = vcombine.low %v90_v51, %v94_v52 }
  0x34   :  { %v3012_v18 = vld [vmem:[#allocation6 + $0x264] ss:$16 sps:$4 sm:$0xff]   ;;  %v3015_v20 = vld [vmem:[#allocation6 + $0x260] ss:$16 sps:$4 sm:$0xff]  }
  0x35   :  { %1678 = vmatpush1.bf16.msra.mxu0 %v3002_v11  ;;  %v3016_v21 = vld [vmem:[#allocation6 + $0x44] ss:$16 sps:$4 sm:$0xff]   ;;  %v3020_v23 = vld [vmem:[#allocation6 + $0x40] ss:$16 sps:$4 sm:$0xff]  }
  0x36   :  { %1721 = vmatpush1.bf16.msra.mxu1 %v3003_v12  ;;  %1679 = vmatprep.subr.bf16.mxu0 %v3004_v13  ;;  %v3018_v22 = vld [vmem:[#allocation6 + $0x244] ss:$16 sps:$4 sm:$0xff]   ;;  %v3021_v24 = vld [vmem:[#allocation6 + $0x240] ss:$16 sps:$4 sm:$0xff]  }
  0x37   :  { %1722 = vmatprep.subr.bf16.mxu1 %v3006_v14  ;;  %v3022_v25 = vld [vmem:[#allocation6 + $0x24] ss:$16 sps:$4 sm:$0xff]   ;;  %v3026_v27 = vld [vmem:[#allocation6 + $0x20] ss:$16 sps:$4 sm:$0xff]  }
  0x38   :  { %v3024_v26 = vld [vmem:[#allocation6 + $0x224] ss:$16 sps:$4 sm:$0xff]   ;;  %v3027_v28 = vld [vmem:[#allocation6 + $0x220] ss:$16 sps:$4 sm:$0xff]  }
  0x39   :  { %1680 = vmatpush1.bf16.msra.mxu0 %v3008_v15  ;;  %v3028_v29 = vld [vmem:[#allocation6 + $0x4] ss:$16 sps:$4 sm:$0xff]   ;;  %v3032_v31 = vld [vmem:[#allocation6] ss:$16 sps:$4 sm:$0xff]  }
  0x3a   :  { %1723 = vmatpush1.bf16.msra.mxu1 %v3009_v16  ;;  %1681 = vmatprep.subr.bf16.mxu0 %v3010_v17  ;;  %v3030_v30 = vld [vmem:[#allocation6 + $0x204] ss:$16 sps:$4 sm:$0xff]   ;;  %v3033_v32 = vld [vmem:[#allocation6 + $0x200] ss:$16 sps:$4 sm:$0xff]  }
  0x3b   :  { %1724 = vmatprep.subr.bf16.mxu1 %v3012_v18  ;;  %v3034_v33 = vld [vmem:[#allocation6 + $0x1e4] ss:$16 sps:$4 sm:$0xff]   ;;  %v3038_v35 = vld [vmem:[#allocation6 + $0x1e0] ss:$16 sps:$4 sm:$0xff]  }
  0x3c   :  { %v3036_v34 = vld [vmem:[#allocation6 + $0x3e4] ss:$16 sps:$4 sm:$0xff]   ;;  %v3039_v36 = vld [vmem:[#allocation6 + $0x3e0] ss:$16 sps:$4 sm:$0xff]  }
  0x3d   :  { %1682 = vmatpush1.bf16.msra.mxu0 %v3014_v19  ;;  %v3040_v37 = vld [vmem:[#allocation6 + $0x1c4] ss:$16 sps:$4 sm:$0xff]   ;;  %v3044_v39 = vld [vmem:[#allocation6 + $0x1c0] ss:$16 sps:$4 sm:$0xff]  }
  0x3e   :  { %1725 = vmatpush1.bf16.msra.mxu1 %v3015_v20  ;;  %1683 = vmatprep.subr.bf16.mxu0 %v3016_v21  ;;  %v3042_v38 = vld [vmem:[#allocation6 + $0x3c4] ss:$16 sps:$4 sm:$0xff]   ;;  %v3045_v40 = vld [vmem:[#allocation6 + $0x3c0] ss:$16 sps:$4 sm:$0xff]  }
  0x3f   :  { %1726 = vmatprep.subr.bf16.mxu1 %v3018_v22  ;;  %v3046_v41 = vld [vmem:[#allocation6 + $0x1a4] ss:$16 sps:$4 sm:$0xff]   ;;  %v3050_v43 = vld [vmem:[#allocation6 + $0x1a0] ss:$16 sps:$4 sm:$0xff]  }
  0x40   :  { %v3048_v42 = vld [vmem:[#allocation6 + $0x3a4] ss:$16 sps:$4 sm:$0xff]   ;;  %v3051_v44 = vld [vmem:[#allocation6 + $0x3a0] ss:$16 sps:$4 sm:$0xff]  }
  0x41   :  { %1684 = vmatpush1.bf16.msra.mxu0 %v3020_v23  ;;  %v3052_v45 = vld [vmem:[#allocation6 + $0x184] ss:$16 sps:$4 sm:$0xff]   ;;  %v3056_v47 = vld [vmem:[#allocation6 + $0x180] ss:$16 sps:$4 sm:$0xff]  }
  0x42   :  { %1727 = vmatpush1.bf16.msra.mxu1 %v3021_v24  ;;  %1685 = vmatprep.subr.bf16.mxu0 %v3022_v25  ;;  %v3054_v46 = vld [vmem:[#allocation6 + $0x384] ss:$16 sps:$4 sm:$0xff]   ;;  %v3057_v48 = vld [vmem:[#allocation6 + $0x380] ss:$16 sps:$4 sm:$0xff]  }
  0x43   :  { %1728 = vmatprep.subr.bf16.mxu1 %v3024_v26  ;;  %v89_v49 = vld [vmem:[#allocation4] sm:$0xff] }
  0x44   :  { %v93_v50 = vld [vmem:[#allocation4 + $0x20] sm:$0xff] }
  0x45   :  { %1686 = vmatpush1.bf16.msra.mxu0 %v3026_v27  ;;  %v3058_v53 = vld [vmem:[#allocation6 + $0x164] ss:$16 sps:$4 sm:$0xff]   ;;  %v3599_v54 = vcombine.high %v89_v49, %v93_v50  ;;  %v3062_v57 = vld [vmem:[#allocation6 + $0x160] ss:$16 sps:$4 sm:$0xff]   ;;  %v3605_v9 = vcombine.low %v89_v49, %v93_v50 }
  0x46   :  { %1729 = vmatpush1.bf16.msra.mxu1 %v3027_v28  ;;  %1687 = vmatprep.subr.bf16.mxu0 %v3028_v29  ;;  %v3060_v55 = vld [vmem:[#allocation6 + $0x364] ss:$16 sps:$4 sm:$0xff]   ;;  %v3063_v58 = vld [vmem:[#allocation6 + $0x360] ss:$16 sps:$4 sm:$0xff]  }
  0x47   :  { %1730 = vmatprep.subr.bf16.mxu1 %v3030_v30  ;;  %1705 = vmatprep.mubr.bf16.mxu0 %v3599_v54  ;;  %v3064_v59 = vld [vmem:[#allocation6 + $0x144] ss:$16 sps:$4 sm:$0xff]   ;;  %v3068_v61 = vld [vmem:[#allocation6 + $0x140] ss:$16 sps:$4 sm:$0xff]  }
  0x48   :  { %v3066_v60 = vld [vmem:[#allocation6 + $0x344] ss:$16 sps:$4 sm:$0xff]   ;;  %v3069_v62 = vld [vmem:[#allocation6 + $0x340] ss:$16 sps:$4 sm:$0xff]  }
  0x49   :  { %1688 = vmatpush1.bf16.msra.mxu0 %v3032_v31  ;;  %v3070_v63 = vld [vmem:[#allocation6 + $0x124] ss:$16 sps:$4 sm:$0xff]   ;;  %v3074_v1 = vld [vmem:[#allocation6 + $0x120] ss:$16 sps:$4 sm:$0xff]  }
  0x4a   :  { %1731 = vmatpush1.bf16.msra.mxu1 %v3033_v32  ;;  %1689 = vmatprep.subr.bf16.mxu0 %v3034_v33  ;;  %v3072_v0 = vld [vmem:[#allocation6 + $0x324] ss:$16 sps:$4 sm:$0xff]   ;;  %v3075_v2 = vld [vmem:[#allocation6 + $0x320] ss:$16 sps:$4 sm:$0xff]  }
  0x4b   :  { %1732 = vmatprep.subr.bf16.mxu1 %v3036_v34  ;;  %v3076_v3 = vld [vmem:[#allocation6 + $0x104] ss:$16 sps:$4 sm:$0xff]   ;;  %v3080_v5 = vld [vmem:[#allocation6 + $0x100] ss:$16 sps:$4 sm:$0xff]  }
  0x4c   :  { %v3078_v4 = vld [vmem:[#allocation6 + $0x304] ss:$16 sps:$4 sm:$0xff]   ;;  %v3081_v6 = vld [vmem:[#allocation6 + $0x300] ss:$16 sps:$4 sm:$0xff]  }
  0x4d   :  { %1690 = vmatpush2.bf16.msra.mxu0 %v3038_v35  ;;  %v3084_v7 = vld [vmem:[#allocation6 + $0x4e4] ss:$16 sps:$4 sm:$0xff]   ;;  %v3082_v11 = vld [vmem:[#allocation6 + $0x4e0] ss:$16 sps:$4 sm:$0xff]  }
  0x4e   :  { %1733 = vmatpush2.bf16.msra.mxu1 %v3039_v36  ;;  %1691 = vmatprep.subr.bf16.mxu0 %v3040_v37  ;;  %v3087_v8 = vld [vmem:[#allocation6 + $0x6e4] ss:$16 sps:$4 sm:$0xff]   ;;  %v3085_v12 = vld [vmem:[#allocation6 + $0x6e0] ss:$16 sps:$4 sm:$0xff]  }
  0x4f   :  { %1734 = vmatprep.subr.bf16.mxu1 %v3042_v38  ;;  %v3090_v13 = vld [vmem:[#allocation6 + $0x4c4] ss:$16 sps:$4 sm:$0xff]   ;;  %v3088_v15 = vld [vmem:[#allocation6 + $0x4c0] ss:$16 sps:$4 sm:$0xff]  }
  0x50   :  { %v3093_v14 = vld [vmem:[#allocation6 + $0x6c4] ss:$16 sps:$4 sm:$0xff]   ;;  %v3091_v16 = vld [vmem:[#allocation6 + $0x6c0] ss:$16 sps:$4 sm:$0xff]  }
  0x51   :  { %1692 = vmatpush2.bf16.msra.mxu0 %v3044_v39  ;;  %v3096_v17 = vld [vmem:[#allocation6 + $0x4a4] ss:$16 sps:$4 sm:$0xff]   ;;  %v3094_v19 = vld [vmem:[#allocation6 + $0x4a0] ss:$16 sps:$4 sm:$0xff]   ;;  %v3615_v39 = vld [vmem:[#allocation4 + $0x18] sm:$0xff] }
  0x52   :  { %1735 = vmatpush2.bf16.msra.mxu1 %v3045_v40  ;;  %1693 = vmatprep.subr.bf16.mxu0 %v3046_v41  ;;  %v3099_v18 = vld [vmem:[#allocation6 + $0x6a4] ss:$16 sps:$4 sm:$0xff]   ;;  %v3097_v20 = vld [vmem:[#allocation6 + $0x6a0] ss:$16 sps:$4 sm:$0xff]   ;;  %v3617_v40 = vld [vmem:[#allocation4 + $0x38] sm:$0xff] }
  0x53   :  { %1736 = vmatprep.subr.bf16.mxu1 %v3048_v42  ;;  %v3102_v21 = vld [vmem:[#allocation6 + $0x484] ss:$16 sps:$4 sm:$0xff]   ;;  %v3100_v23 = vld [vmem:[#allocation6 + $0x480] ss:$16 sps:$4 sm:$0xff]  }
  0x54   :  { %v3105_v22 = vld [vmem:[#allocation6 + $0x684] ss:$16 sps:$4 sm:$0xff]   ;;  %v3103_v24 = vld [vmem:[#allocation6 + $0x680] ss:$16 sps:$4 sm:$0xff]  }
  0x55   :  { %1694 = vmatpush2.bf16.msra.mxu0 %v3050_v43  ;;  %v3108_v25 = vld [vmem:[#allocation6 + $0x464] ss:$16 sps:$4 sm:$0xff]   ;;  %v3106_v27 = vld [vmem:[#allocation6 + $0x460] ss:$16 sps:$4 sm:$0xff]  }
  0x56   :  { %1737 = vmatpush2.bf16.msra.mxu1 %v3051_v44  ;;  %1695 = vmatprep.subr.bf16.mxu0 %v3052_v45  ;;  %v3111_v26 = vld [vmem:[#allocation6 + $0x664] ss:$16 sps:$4 sm:$0xff]   ;;  %v3109_v28 = vld [vmem:[#allocation6 + $0x660] ss:$16 sps:$4 sm:$0xff]   ;;  %v3625_v44 = vcombine.high %v3615_v39, %v3617_v40 }
  0x57   :  { %1738 = vmatprep.subr.bf16.mxu1 %v3054_v46  ;;  %v3114_v29 = vld [vmem:[#allocation6 + $0x444] ss:$16 sps:$4 sm:$0xff]   ;;  %v3112_v31 = vld [vmem:[#allocation6 + $0x440] ss:$16 sps:$4 sm:$0xff]  }
  0x58   :  { %v3117_v30 = vld [vmem:[#allocation6 + $0x644] ss:$16 sps:$4 sm:$0xff]   ;;  %v3115_v32 = vld [vmem:[#allocation6 + $0x640] ss:$16 sps:$4 sm:$0xff]  }
  0x59   :  { %1696 = vmatpush2.bf16.msra.mxu0 %v3056_v47  ;;  %v3120_v33 = vld [vmem:[#allocation6 + $0x424] ss:$16 sps:$4 sm:$0xff]   ;;  %v3118_v35 = vld [vmem:[#allocation6 + $0x420] ss:$16 sps:$4 sm:$0xff]  }
  0x5a   :  { %1739 = vmatpush2.bf16.msra.mxu1 %v3057_v48  ;;  %1697 = vmatprep.subr.bf16.mxu0 %v3058_v53  ;;  %v3123_v34 = vld [vmem:[#allocation6 + $0x624] ss:$16 sps:$4 sm:$0xff]   ;;  %v3121_v36 = vld [vmem:[#allocation6 + $0x620] ss:$16 sps:$4 sm:$0xff]  }
  0x5b   :  { %1740 = vmatprep.subr.bf16.mxu1 %v3060_v55  ;;  %v3611_v37 = vld [vmem:[#allocation4 + $0x10] sm:$0xff] }
  0x5c   :  { %v3613_v38 = vld [vmem:[#allocation4 + $0x30] sm:$0xff] }
  0x5d   :  { %1698 = vmatpush2.bf16.msra.mxu0 %v3062_v57  ;;  %v3126_v41 = vld [vmem:[#allocation6 + $0x404] ss:$16 sps:$4 sm:$0xff]   ;;  %v3621_v42 = vcombine.high %v3611_v37, %v3613_v38  ;;  %v3124_v45 = vld [vmem:[#allocation6 + $0x400] ss:$16 sps:$4 sm:$0xff]  }
  0x5e   :  { %1741 = vmatpush2.bf16.msra.mxu1 %v3063_v58  ;;  %1699 = vmatprep.subr.bf16.mxu0 %v3064_v59  ;;  %v3129_v43 = vld [vmem:[#allocation6 + $0x604] ss:$16 sps:$4 sm:$0xff]   ;;  %v3127_v46 = vld [vmem:[#allocation6 + $0x600] ss:$16 sps:$4 sm:$0xff]  }
  0x5f   :  { %1742 = vmatprep.subr.bf16.mxu1 %v3066_v60  ;;  %v3132_v47 = vld [vmem:[#allocation6 + $0x5e4] ss:$16 sps:$4 sm:$0xff]   ;;  %v3130_v49 = vld [vmem:[#allocation6 + $0x5e0] ss:$16 sps:$4 sm:$0xff]  }
  0x60   :  { %v3135_v48 = vld [vmem:[#allocation6 + $0x7e4] ss:$16 sps:$4 sm:$0xff]   ;;  %v3133_v50 = vld [vmem:[#allocation6 + $0x7e0] ss:$16 sps:$4 sm:$0xff]  }
  0x61   :  { %1700 = vmatpush2.bf16.msra.mxu0 %v3068_v61  ;;  %v3138_v51 = vld [vmem:[#allocation6 + $0x5c4] ss:$16 sps:$4 sm:$0xff]   ;;  %v3136_v53 = vld [vmem:[#allocation6 + $0x5c0] ss:$16 sps:$4 sm:$0xff]  }
  0x62   :  { %1743 = vmatpush2.bf16.msra.mxu1 %v3069_v62  ;;  %1701 = vmatprep.subr.bf16.mxu0 %v3070_v63  ;;  %v3141_v52 = vld [vmem:[#allocation6 + $0x7c4] ss:$16 sps:$4 sm:$0xff]   ;;  %v3139_v55 = vld [vmem:[#allocation6 + $0x7c0] ss:$16 sps:$4 sm:$0xff]  }
  0x63   :  { %1744 = vmatprep.subr.bf16.mxu1 %v3072_v0  ;;  %v3144_v57 = vld [vmem:[#allocation6 + $0x5a4] ss:$16 sps:$4 sm:$0xff]   ;;  %v3142_v59 = vld [vmem:[#allocation6 + $0x5a0] ss:$16 sps:$4 sm:$0xff]  }
  0x64   :  { %v3147_v58 = vld [vmem:[#allocation6 + $0x7a4] ss:$16 sps:$4 sm:$0xff]   ;;  %v3145_v60 = vld [vmem:[#allocation6 + $0x7a0] ss:$16 sps:$4 sm:$0xff]  }
  0x65   :  { %1702 = vmatpush2.bf16.msra.mxu0 %v3074_v1  ;;  %v3150_v61 = vld [vmem:[#allocation6 + $0x584] ss:$16 sps:$4 sm:$0xff]   ;;  %v3148_v63 = vld [vmem:[#allocation6 + $0x580] ss:$16 sps:$4 sm:$0xff]  }
  0x66   :  { %1745 = vmatpush2.bf16.msra.mxu1 %v3075_v2  ;;  %1703 = vmatprep.subr.bf16.mxu0 %v3076_v3  ;;  %v3153_v62 = vld [vmem:[#allocation6 + $0x784] ss:$16 sps:$4 sm:$0xff]   ;;  %v3151_v0 = vld [vmem:[#allocation6 + $0x780] ss:$16 sps:$4 sm:$0xff]  }
  0x67   :  { %1746 = vmatprep.subr.bf16.mxu1 %v3078_v4  ;;  %v3156_v1 = vld [vmem:[#allocation6 + $0x564] ss:$16 sps:$4 sm:$0xff]   ;;  %v3154_v3 = vld [vmem:[#allocation6 + $0x560] ss:$16 sps:$4 sm:$0xff]  }
  0x68   :  { %v3159_v2 = vld [vmem:[#allocation6 + $0x764] ss:$16 sps:$4 sm:$0xff]   ;;  %v3157_v4 = vld [vmem:[#allocation6 + $0x760] ss:$16 sps:$4 sm:$0xff]  }
  0x69   :  { %1704 = vmatpush2.bf16.msra.mxu0 %v3080_v5  ;;  %v3162_v5 = vld [vmem:[#allocation6 + $0x544] ss:$16 sps:$4 sm:$0xff]  }
  0x6a   :  { %1747 = vmatpush2.bf16.msra.mxu1 %v3081_v6  ;;  %1759 = vmatprep.subr.bf16.mxu0 %v3084_v7  ;;  %v3165_v6 = vld [vmem:[#allocation6 + $0x744] ss:$16 sps:$4 sm:$0xff]   ;;  %v3160_v7 = vld [vmem:[#allocation6 + $0x540] ss:$16 sps:$4 sm:$0xff]  }
  0x6b   :  { %1802 = vmatprep.subr.bf16.mxu1 %v3087_v8  ;;  %v3163_v8 = vld [vmem:[#allocation6 + $0x740] ss:$16 sps:$4 sm:$0xff]  }
  0x6c   :  { %1706 = vmatmul.mubr.bf16.vlgmr.msra.gmra.mxu0 %v3605_v9 }
  0x6d   :  { %1749 = vmatmul.mubr.bf16.vlgmr.msra.gmra.mxu1 %v3607_v10  ;;  %1760 = vmatpush1.bf16.msra.mxu0 %v3082_v11  ;;  %v3168_v11 = vld [vmem:[#allocation6 + $0x524] ss:$16 sps:$4 sm:$0xff]  }
  0x6e   :  { %1803 = vmatpush1.bf16.msra.mxu1 %v3085_v12  ;;  %1761 = vmatprep.subr.bf16.mxu0 %v3090_v13  ;;  %v3171_v12 = vld [vmem:[#allocation6 + $0x724] ss:$16 sps:$4 sm:$0xff]   ;;  %v3166_v13 = vld [vmem:[#allocation6 + $0x520] ss:$16 sps:$4 sm:$0xff]  }
  0x6f   :  { %1804 = vmatprep.subr.bf16.mxu1 %v3093_v14  ;;  %1791 = vmatprep.mubr.bf16.mxu0 %v3621_v42  ;;  %v3169_v14 = vld [vmem:[#allocation6 + $0x720] ss:$16 sps:$4 sm:$0xff]  }
  0x70   :  { %1834 = vmatprep.mubr.bf16.mxu1 %v3625_v44 }
  0x71   :  { %1762 = vmatpush1.bf16.msra.mxu0 %v3088_v15  ;;  %v3174_v15 = vld [vmem:[#allocation6 + $0x504] ss:$16 sps:$4 sm:$0xff]  }
  0x72   :  { %1805 = vmatpush1.bf16.msra.mxu1 %v3091_v16  ;;  %1763 = vmatprep.subr.bf16.mxu0 %v3096_v17  ;;  %v3177_v16 = vld [vmem:[#allocation6 + $0x704] ss:$16 sps:$4 sm:$0xff]   ;;  %v3172_v17 = vld [vmem:[#allocation6 + $0x500] ss:$16 sps:$4 sm:$0xff]  }
  0x73   :  { %1806 = vmatprep.subr.bf16.mxu1 %v3099_v18  ;;  %v3175_v18 = vld [vmem:[#allocation6 + $0x700] ss:$16 sps:$4 sm:$0xff]  }
  0x75   :  { %1764 = vmatpush1.bf16.msra.mxu0 %v3094_v19  ;;  %v3180_v19 = vld [vmem:[#allocation6 + $0xec] ss:$16 sps:$4 sm:$0xff]  }
  0x76   :  { %1807 = vmatpush1.bf16.msra.mxu1 %v3097_v20  ;;  %1765 = vmatprep.subr.bf16.mxu0 %v3102_v21  ;;  %v3183_v20 = vld [vmem:[#allocation6 + $0x2ec] ss:$16 sps:$4 sm:$0xff]   ;;  %v3631_v21 = vcombine.low %v3611_v37, %v3613_v38 }
  0x77   :  { %1808 = vmatprep.subr.bf16.mxu1 %v3105_v22  ;;  %v3635_v22 = vcombine.low %v3615_v39, %v3617_v40  ;;  %v3204_v37 = vld [vmem:[#allocation6 + $0x6c] ss:$16 sps:$4 sm:$0xff]   ;;  %v3202_v39 = vld [vmem:[#allocation6 + $0x68] ss:$16 sps:$4 sm:$0xff]  }
  0x78   :  { %v3207_v38 = vld [vmem:[#allocation6 + $0x26c] ss:$16 sps:$4 sm:$0xff]  }
  0x79   :  { %1766 = vmatpush1.bf16.msra.mxu0 %v3100_v23  ;;  %v3178_v23 = vld [vmem:[#allocation6 + $0xe8] ss:$16 sps:$4 sm:$0xff]   ;;  %v3213_v40 = vld [vmem:[#allocation6 + $0x24c] ss:$16 sps:$4 sm:$0xff]  }
  0x7a   :  { %1809 = vmatpush1.bf16.msra.mxu1 %v3103_v24  ;;  %1767 = vmatprep.subr.bf16.mxu0 %v3108_v25  ;;  %v3181_v24 = vld [vmem:[#allocation6 + $0x2e8] ss:$16 sps:$4 sm:$0xff]   ;;  %v3186_v25 = vld [vmem:[#allocation6 + $0xcc] ss:$16 sps:$4 sm:$0xff]  }
  0x7b   :  { %1810 = vmatprep.subr.bf16.mxu1 %v3111_v26  ;;  %v3189_v26 = vld [vmem:[#allocation6 + $0x2cc] ss:$16 sps:$4 sm:$0xff]  }
  0x7d   :  { %1768 = vmatpush1.bf16.msra.mxu0 %v3106_v27  ;;  %v3184_v27 = vld [vmem:[#allocation6 + $0xc8] ss:$16 sps:$4 sm:$0xff]  }
  0x7e   :  { %1811 = vmatpush1.bf16.msra.mxu1 %v3109_v28  ;;  %1769 = vmatprep.subr.bf16.mxu0 %v3114_v29  ;;  %v3187_v28 = vld [vmem:[#allocation6 + $0x2c8] ss:$16 sps:$4 sm:$0xff]   ;;  %v3192_v29 = vld [vmem:[#allocation6 + $0xac] ss:$16 sps:$4 sm:$0xff]  }
  0x7f   :  { %1812 = vmatprep.subr.bf16.mxu1 %v3117_v30  ;;  %v3195_v30 = vld [vmem:[#allocation6 + $0x2ac] ss:$16 sps:$4 sm:$0xff]  }
  0x81   :  { %1770 = vmatpush1.bf16.msra.mxu0 %v3112_v31  ;;  %v3190_v31 = vld [vmem:[#allocation6 + $0xa8] ss:$16 sps:$4 sm:$0xff]  }
  0x82   :  { %1813 = vmatpush1.bf16.msra.mxu1 %v3115_v32  ;;  %1771 = vmatprep.subr.bf16.mxu0 %v3120_v33  ;;  %v3193_v32 = vld [vmem:[#allocation6 + $0x2a8] ss:$16 sps:$4 sm:$0xff]   ;;  %v3198_v33 = vld [vmem:[#allocation6 + $0x8c] ss:$16 sps:$4 sm:$0xff]  }
  0x83   :  { %1814 = vmatprep.subr.bf16.mxu1 %v3123_v34  ;;  %v3201_v34 = vld [vmem:[#allocation6 + $0x28c] ss:$16 sps:$4 sm:$0xff]  }
  0x85   :  { %1772 = vmatpush1.bf16.msra.mxu0 %v3118_v35  ;;  %v3196_v35 = vld [vmem:[#allocation6 + $0x88] ss:$16 sps:$4 sm:$0xff]  }
  0x86   :  { %1815 = vmatpush1.bf16.msra.mxu1 %v3121_v36  ;;  %1773 = vmatprep.subr.bf16.mxu0 %v3126_v41  ;;  %v3199_v36 = vld [vmem:[#allocation6 + $0x288] ss:$16 sps:$4 sm:$0xff]  }
  0x87   :  { %1816 = vmatprep.subr.bf16.mxu1 %v3129_v43  ;;  %v3208_v41 = vld [vmem:[#allocation6 + $0x48] ss:$16 sps:$4 sm:$0xff]  }
  0x88   :  { %v3211_v43 = vld [vmem:[#allocation6 + $0x248] ss:$16 sps:$4 sm:$0xff]  }
  0x89   :  { %1774 = vmatpush1.bf16.msra.mxu0 %v3124_v45  ;;  %v3216_v45 = vld [vmem:[#allocation6 + $0x2c] ss:$16 sps:$4 sm:$0xff]  }
  0x8a   :  { %1817 = vmatpush1.bf16.msra.mxu1 %v3127_v46  ;;  %1775 = vmatprep.subr.bf16.mxu0 %v3132_v47  ;;  %v3219_v46 = vld [vmem:[#allocation6 + $0x22c] ss:$16 sps:$4 sm:$0xff]   ;;  %v3214_v47 = vld [vmem:[#allocation6 + $0x28] ss:$16 sps:$4 sm:$0xff]  }
  0x8b   :  { %1818 = vmatprep.subr.bf16.mxu1 %v3135_v48  ;;  %v3217_v48 = vld [vmem:[#allocation6 + $0x228] ss:$16 sps:$4 sm:$0xff]  }
  0x8d   :  { %1776 = vmatpush2.bf16.msra.mxu0 %v3130_v49  ;;  %v3222_v49 = vld [vmem:[#allocation6 + $0xc] ss:$16 sps:$4 sm:$0xff]  }
  0x8e   :  { %1819 = vmatpush2.bf16.msra.mxu1 %v3133_v50  ;;  %1777 = vmatprep.subr.bf16.mxu0 %v3138_v51  ;;  %v3225_v50 = vld [vmem:[#allocation6 + $0x20c] ss:$16 sps:$4 sm:$0xff]   ;;  %v3220_v51 = vld [vmem:[#allocation6 + $0x8] ss:$16 sps:$4 sm:$0xff]  }
  0x8f   :  { %1820 = vmatprep.subr.bf16.mxu1 %v3141_v52  ;;  %v3223_v52 = vld [vmem:[#allocation6 + $0x208] ss:$16 sps:$4 sm:$0xff]  }
  0x91   :  { %1778 = vmatpush2.bf16.msra.mxu0 %v3136_v53  ;;  %v3228_v53 = vld [vmem:[#allocation6 + $0x1ec] ss:$16 sps:$4 sm:$0xff]  }
  0x92   :  { %1821 = vmatpush2.bf16.msra.mxu1 %v3139_v55  ;;  %1779 = vmatprep.subr.bf16.mxu0 %v3144_v57  ;;  %v3231_v55 = vld [vmem:[#allocation6 + $0x3ec] ss:$16 sps:$4 sm:$0xff]   ;;  %v3226_v57 = vld [vmem:[#allocation6 + $0x1e8] ss:$16 sps:$4 sm:$0xff]  }
  0x93   :  { %1822 = vmatprep.subr.bf16.mxu1 %v3147_v58  ;;  %v3229_v58 = vld [vmem:[#allocation6 + $0x3e8] ss:$16 sps:$4 sm:$0xff]  }
  0x95   :  { %1780 = vmatpush2.bf16.msra.mxu0 %v3142_v59  ;;  %v3234_v59 = vld [vmem:[#allocation6 + $0x1cc] ss:$16 sps:$4 sm:$0xff]  }
  0x96   :  { %1823 = vmatpush2.bf16.msra.mxu1 %v3145_v60  ;;  %1781 = vmatprep.subr.bf16.mxu0 %v3150_v61  ;;  %v3237_v60 = vld [vmem:[#allocation6 + $0x3cc] ss:$16 sps:$4 sm:$0xff]   ;;  %v3232_v61 = vld [vmem:[#allocation6 + $0x1c8] ss:$16 sps:$4 sm:$0xff]  }
  0x97   :  { %1824 = vmatprep.subr.bf16.mxu1 %v3153_v62  ;;  %v3235_v62 = vld [vmem:[#allocation6 + $0x3c8] ss:$16 sps:$4 sm:$0xff]  }
  0x99   :  { %1782 = vmatpush2.bf16.msra.mxu0 %v3148_v63  ;;  %v3240_v63 = vld [vmem:[#allocation6 + $0x1ac] ss:$16 sps:$4 sm:$0xff]  }
  0x9a   :  { %1825 = vmatpush2.bf16.msra.mxu1 %v3151_v0  ;;  %1783 = vmatprep.subr.bf16.mxu0 %v3156_v1  ;;  %v3243_v0 = vld [vmem:[#allocation6 + $0x3ac] ss:$16 sps:$4 sm:$0xff]   ;;  %v3238_v1 = vld [vmem:[#allocation6 + $0x1a8] ss:$16 sps:$4 sm:$0xff]  }
  0x9b   :  { %1826 = vmatprep.subr.bf16.mxu1 %v3159_v2  ;;  %v3241_v2 = vld [vmem:[#allocation6 + $0x3a8] ss:$16 sps:$4 sm:$0xff]  }
  0x9d   :  { %1784 = vmatpush2.bf16.msra.mxu0 %v3154_v3  ;;  %v3246_v3 = vld [vmem:[#allocation6 + $0x18c] ss:$16 sps:$4 sm:$0xff]  }
  0x9e   :  { %1827 = vmatpush2.bf16.msra.mxu1 %v3157_v4  ;;  %1785 = vmatprep.subr.bf16.mxu0 %v3162_v5  ;;  %v3249_v4 = vld [vmem:[#allocation6 + $0x38c] ss:$16 sps:$4 sm:$0xff]   ;;  %v3244_v5 = vld [vmem:[#allocation6 + $0x188] ss:$16 sps:$4 sm:$0xff]  }
  0x9f   :  { %1828 = vmatprep.subr.bf16.mxu1 %v3165_v6  ;;  %v3247_v6 = vld [vmem:[#allocation6 + $0x388] ss:$16 sps:$4 sm:$0xff]  }
  0xa1   :  { %1786 = vmatpush2.bf16.msra.mxu0 %v3160_v7  ;;  %v3252_v7 = vld [vmem:[#allocation6 + $0x16c] ss:$16 sps:$4 sm:$0xff]  }
  0xa2   :  { %1829 = vmatpush2.bf16.msra.mxu1 %v3163_v8  ;;  %1787 = vmatprep.subr.bf16.mxu0 %v3168_v11  ;;  %v3255_v8 = vld [vmem:[#allocation6 + $0x36c] ss:$16 sps:$4 sm:$0xff]   ;;  %v3250_v11 = vld [vmem:[#allocation6 + $0x168] ss:$16 sps:$4 sm:$0xff]  }
  0xa3   :  { %1830 = vmatprep.subr.bf16.mxu1 %v3171_v12  ;;  %v3253_v12 = vld [vmem:[#allocation6 + $0x368] ss:$16 sps:$4 sm:$0xff]  }
  0xa5   :  { %1788 = vmatpush2.bf16.msra.mxu0 %v3166_v13  ;;  %v3258_v13 = vld [vmem:[#allocation6 + $0x14c] ss:$16 sps:$4 sm:$0xff]  }
  0xa6   :  { %1831 = vmatpush2.bf16.msra.mxu1 %v3169_v14  ;;  %1789 = vmatprep.subr.bf16.mxu0 %v3174_v15  ;;  %v3261_v14 = vld [vmem:[#allocation6 + $0x34c] ss:$16 sps:$4 sm:$0xff]   ;;  %v3256_v15 = vld [vmem:[#allocation6 + $0x148] ss:$16 sps:$4 sm:$0xff]  }
  0xa7   :  { %1832 = vmatprep.subr.bf16.mxu1 %v3177_v16  ;;  %v3259_v16 = vld [vmem:[#allocation6 + $0x348] ss:$16 sps:$4 sm:$0xff]  }
  0xa9   :  { %1790 = vmatpush2.bf16.msra.mxu0 %v3172_v17  ;;  %v3264_v17 = vld [vmem:[#allocation6 + $0x12c] ss:$16 sps:$4 sm:$0xff]  }
  0xaa   :  { %1833 = vmatpush2.bf16.msra.mxu1 %v3175_v18  ;;  %1845 = vmatprep.subr.bf16.mxu0 %v3180_v19  ;;  %v3267_v18 = vld [vmem:[#allocation6 + $0x32c] ss:$16 sps:$4 sm:$0xff]   ;;  %v3262_v19 = vld [vmem:[#allocation6 + $0x128] ss:$16 sps:$4 sm:$0xff]  }
  0xab   :  { %1888 = vmatprep.subr.bf16.mxu1 %v3183_v20  ;;  %v3265_v20 = vld [vmem:[#allocation6 + $0x328] ss:$16 sps:$4 sm:$0xff]  }
  0xac   :  { %1792 = vmatmul.mubr.bf16.vlgmr.msra.gmra.mxu0 %v3631_v21 }
  0xad   :  { %1835 = vmatmul.mubr.bf16.vlgmr.msra.gmra.mxu1 %v3635_v22  ;;  %1846 = vmatpush1.bf16.msra.mxu0 %v3178_v23  ;;  %v3270_v23 = vld [vmem:[#allocation6 + $0x10c] ss:$16 sps:$4 sm:$0xff]  }
  0xae   :  { %1889 = vmatpush1.bf16.msra.mxu1 %v3181_v24  ;;  %1847 = vmatprep.subr.bf16.mxu0 %v3186_v25  ;;  %v3273_v24 = vld [vmem:[#allocation6 + $0x30c] ss:$16 sps:$4 sm:$0xff]   ;;  %v3268_v25 = vld [vmem:[#allocation6 + $0x108] ss:$16 sps:$4 sm:$0xff]  }
  0xaf   :  { %1890 = vmatprep.subr.bf16.mxu1 %v3189_v26  ;;  %1877 = vmatprep.mubr.bf16.mxu0 %v3599_v54  ;;  %v3205_v54 = vld [vmem:[#allocation6 + $0x268] ss:$16 sps:$4 sm:$0xff]  }
  0xb0   :  { %1920 = vmatprep.mubr.bf16.mxu1 %v3601_v56  ;;  %v3210_v56 = vld [vmem:[#allocation6 + $0x4c] ss:$16 sps:$4 sm:$0xff]   ;;  %v3271_v26 = vld [vmem:[#allocation6 + $0x308] ss:$16 sps:$4 sm:$0xff]  }
  0xb1   :  { %1848 = vmatpush1.bf16.msra.mxu0 %v3184_v27  ;;  %v3276_v27 = vld [vmem:[#allocation6 + $0x4ec] ss:$16 sps:$4 sm:$0xff]  }
  0xb2   :  { %1891 = vmatpush1.bf16.msra.mxu1 %v3187_v28  ;;  %1849 = vmatprep.subr.bf16.mxu0 %v3192_v29  ;;  %v3279_v28 = vld [vmem:[#allocation6 + $0x6ec] ss:$16 sps:$4 sm:$0xff]   ;;  %v3274_v29 = vld [vmem:[#allocation6 + $0x4e8] ss:$16 sps:$4 sm:$0xff]  }
  0xb3   :  { %1892 = vmatprep.subr.bf16.mxu1 %v3195_v30  ;;  %v3277_v30 = vld [vmem:[#allocation6 + $0x6e8] ss:$16 sps:$4 sm:$0xff]  }
  0xb5   :  { %1850 = vmatpush1.bf16.msra.mxu0 %v3190_v31  ;;  %v3282_v31 = vld [vmem:[#allocation6 + $0x4cc] ss:$16 sps:$4 sm:$0xff]  }
  0xb6   :  { %1893 = vmatpush1.bf16.msra.mxu1 %v3193_v32  ;;  %1851 = vmatprep.subr.bf16.mxu0 %v3198_v33  ;;  %v3285_v32 = vld [vmem:[#allocation6 + $0x6cc] ss:$16 sps:$4 sm:$0xff]   ;;  %v3280_v33 = vld [vmem:[#allocation6 + $0x4c8] ss:$16 sps:$4 sm:$0xff]  }
  0xb7   :  { %1894 = vmatprep.subr.bf16.mxu1 %v3201_v34  ;;  %v3283_v34 = vld [vmem:[#allocation6 + $0x6c8] ss:$16 sps:$4 sm:$0xff]  }
  0xb9   :  { %1852 = vmatpush1.bf16.msra.mxu0 %v3196_v35  ;;  %v3288_v35 = vld [vmem:[#allocation6 + $0x4ac] ss:$16 sps:$4 sm:$0xff]  }
  0xba   :  { %1895 = vmatpush1.bf16.msra.mxu1 %v3199_v36  ;;  %1853 = vmatprep.subr.bf16.mxu0 %v3204_v37  ;;  %v3291_v36 = vld [vmem:[#allocation6 + $0x6ac] ss:$16 sps:$4 sm:$0xff]   ;;  %v3286_v37 = vld [vmem:[#allocation6 + $0x4a8] ss:$16 sps:$4 sm:$0xff]  }
  0xbb   :  { %1896 = vmatprep.subr.bf16.mxu1 %v3207_v38  ;;  %v3289_v38 = vld [vmem:[#allocation6 + $0x6a8] ss:$16 sps:$4 sm:$0xff]  }
  0xbd   :  { %1854 = vmatpush1.bf16.msra.mxu0 %v3202_v39  ;;  %v3294_v39 = vld [vmem:[#allocation6 + $0x48c] ss:$16 sps:$4 sm:$0xff]  }
  0xbe   :  { %1897 = vmatpush1.bf16.msra.mxu1 %v3205_v54  ;;  %1855 = vmatprep.subr.bf16.mxu0 %v3210_v56  ;;  %v3295_v54 = vld [vmem:[#allocation6 + $0x688] ss:$16 sps:$4 sm:$0xff]   ;;  %v3300_v56 = vld [vmem:[#allocation6 + $0x46c] ss:$16 sps:$4 sm:$0xff]  }
  0xbf   :  { %1898 = vmatprep.subr.bf16.mxu1 %v3213_v40  ;;  %v3303_v40 = vld [vmem:[#allocation6 + $0x66c] ss:$16 sps:$4 sm:$0xff]  }
  0xc1   :  { %1856 = vmatpush1.bf16.msra.mxu0 %v3208_v41  ;;  %v3298_v41 = vld [vmem:[#allocation6 + $0x468] ss:$16 sps:$4 sm:$0xff]  }
  0xc2   :  { %1899 = vmatpush1.bf16.msra.mxu1 %v3211_v43  ;;  %1857 = vmatprep.subr.bf16.mxu0 %v3216_v45  ;;  %v3309_v43 = vld [vmem:[#allocation6 + $0x64c] ss:$16 sps:$4 sm:$0xff]   ;;  %v3304_v45 = vld [vmem:[#allocation6 + $0x448] ss:$16 sps:$4 sm:$0xff]  }
  0xc3   :  { %1900 = vmatprep.subr.bf16.mxu1 %v3219_v46  ;;  %v3307_v46 = vld [vmem:[#allocation6 + $0x648] ss:$16 sps:$4 sm:$0xff]  }
  0xc5   :  { %1858 = vmatpush1.bf16.msra.mxu0 %v3214_v47  ;;  %v3312_v47 = vld [vmem:[#allocation6 + $0x42c] ss:$16 sps:$4 sm:$0xff]  }
  0xc6   :  { %1901 = vmatpush1.bf16.msra.mxu1 %v3217_v48  ;;  %1859 = vmatprep.subr.bf16.mxu0 %v3222_v49  ;;  %v3315_v48 = vld [vmem:[#allocation6 + $0x62c] ss:$16 sps:$4 sm:$0xff]   ;;  %v3310_v49 = vld [vmem:[#allocation6 + $0x428] ss:$16 sps:$4 sm:$0xff]  }
  0xc7   :  { %1902 = vmatprep.subr.bf16.mxu1 %v3225_v50  ;;  %v3313_v50 = vld [vmem:[#allocation6 + $0x628] ss:$16 sps:$4 sm:$0xff]  }
  0xc9   :  { %1860 = vmatpush1.bf16.msra.mxu0 %v3220_v51  ;;  %v3318_v51 = vld [vmem:[#allocation6 + $0x40c] ss:$16 sps:$4 sm:$0xff]  }
  0xca   :  { %1903 = vmatpush1.bf16.msra.mxu1 %v3223_v52  ;;  %1861 = vmatprep.subr.bf16.mxu0 %v3228_v53  ;;  %v3321_v52 = vld [vmem:[#allocation6 + $0x60c] ss:$16 sps:$4 sm:$0xff]   ;;  %v3316_v53 = vld [vmem:[#allocation6 + $0x408] ss:$16 sps:$4 sm:$0xff]  }
  0xcb   :  { %1904 = vmatprep.subr.bf16.mxu1 %v3231_v55  ;;  %v3319_v55 = vld [vmem:[#allocation6 + $0x608] ss:$16 sps:$4 sm:$0xff]  }
  0xcd   :  { %1862 = vmatpush2.bf16.msra.mxu0 %v3226_v57  ;;  %v3324_v57 = vld [vmem:[#allocation6 + $0x5ec] ss:$16 sps:$4 sm:$0xff]  }
  0xce   :  { %1905 = vmatpush2.bf16.msra.mxu1 %v3229_v58  ;;  %1863 = vmatprep.subr.bf16.mxu0 %v3234_v59  ;;  %v3327_v58 = vld [vmem:[#allocation6 + $0x7ec] ss:$16 sps:$4 sm:$0xff]   ;;  %v3322_v59 = vld [vmem:[#allocation6 + $0x5e8] ss:$16 sps:$4 sm:$0xff]  }
  0xcf   :  { %1906 = vmatprep.subr.bf16.mxu1 %v3237_v60  ;;  %v3325_v60 = vld [vmem:[#allocation6 + $0x7e8] ss:$16 sps:$4 sm:$0xff]  }
  0xd1   :  { %1864 = vmatpush2.bf16.msra.mxu0 %v3232_v61  ;;  %v3330_v61 = vld [vmem:[#allocation6 + $0x5cc] ss:$16 sps:$4 sm:$0xff]  }
  0xd2   :  { %1907 = vmatpush2.bf16.msra.mxu1 %v3235_v62  ;;  %1865 = vmatprep.subr.bf16.mxu0 %v3240_v63  ;;  %v3333_v62 = vld [vmem:[#allocation6 + $0x7cc] ss:$16 sps:$4 sm:$0xff]   ;;  %v3328_v63 = vld [vmem:[#allocation6 + $0x5c8] ss:$16 sps:$4 sm:$0xff]  }
  0xd3   :  { %1908 = vmatprep.subr.bf16.mxu1 %v3243_v0  ;;  %v3331_v0 = vld [vmem:[#allocation6 + $0x7c8] ss:$16 sps:$4 sm:$0xff]  }
  0xd5   :  { %1866 = vmatpush2.bf16.msra.mxu0 %v3238_v1  ;;  %v3336_v1 = vld [vmem:[#allocation6 + $0x5ac] ss:$16 sps:$4 sm:$0xff]  }
  0xd6   :  { %1909 = vmatpush2.bf16.msra.mxu1 %v3241_v2  ;;  %1867 = vmatprep.subr.bf16.mxu0 %v3246_v3  ;;  %v3339_v2 = vld [vmem:[#allocation6 + $0x7ac] ss:$16 sps:$4 sm:$0xff]   ;;  %v3334_v3 = vld [vmem:[#allocation6 + $0x5a8] ss:$16 sps:$4 sm:$0xff]  }
  0xd7   :  { %1910 = vmatprep.subr.bf16.mxu1 %v3249_v4  ;;  %v3337_v4 = vld [vmem:[#allocation6 + $0x7a8] ss:$16 sps:$4 sm:$0xff]  }
  0xd9   :  { %1868 = vmatpush2.bf16.msra.mxu0 %v3244_v5  ;;  %v3342_v5 = vld [vmem:[#allocation6 + $0x58c] ss:$16 sps:$4 sm:$0xff]  }
  0xda   :  { %1911 = vmatpush2.bf16.msra.mxu1 %v3247_v6  ;;  %1869 = vmatprep.subr.bf16.mxu0 %v3252_v7  ;;  %v3345_v6 = vld [vmem:[#allocation6 + $0x78c] ss:$16 sps:$4 sm:$0xff]   ;;  %v3340_v7 = vld [vmem:[#allocation6 + $0x588] ss:$16 sps:$4 sm:$0xff]  }
  0xdb   :  { %1912 = vmatprep.subr.bf16.mxu1 %v3255_v8  ;;  %v3343_v8 = vld [vmem:[#allocation6 + $0x788] ss:$16 sps:$4 sm:$0xff]  }
  0xdd   :  { %1870 = vmatpush2.bf16.msra.mxu0 %v3250_v11  ;;  %v3348_v11 = vld [vmem:[#allocation6 + $0x56c] ss:$16 sps:$4 sm:$0xff]  }
  0xde   :  { %1913 = vmatpush2.bf16.msra.mxu1 %v3253_v12  ;;  %1871 = vmatprep.subr.bf16.mxu0 %v3258_v13  ;;  %v3351_v12 = vld [vmem:[#allocation6 + $0x76c] ss:$16 sps:$4 sm:$0xff]   ;;  %v3346_v13 = vld [vmem:[#allocation6 + $0x568] ss:$16 sps:$4 sm:$0xff]  }
  0xdf   :  { %1914 = vmatprep.subr.bf16.mxu1 %v3261_v14  ;;  %v3349_v14 = vld [vmem:[#allocation6 + $0x768] ss:$16 sps:$4 sm:$0xff]  }
  0xe1   :  { %1872 = vmatpush2.bf16.msra.mxu0 %v3256_v15  ;;  %v3354_v15 = vld [vmem:[#allocation6 + $0x54c] ss:$16 sps:$4 sm:$0xff]  }
  0xe2   :  { %1915 = vmatpush2.bf16.msra.mxu1 %v3259_v16  ;;  %1873 = vmatprep.subr.bf16.mxu0 %v3264_v17  ;;  %v3357_v16 = vld [vmem:[#allocation6 + $0x74c] ss:$16 sps:$4 sm:$0xff]   ;;  %v3352_v17 = vld [vmem:[#allocation6 + $0x548] ss:$16 sps:$4 sm:$0xff]  }
  0xe3   :  { %1916 = vmatprep.subr.bf16.mxu1 %v3267_v18  ;;  %v3355_v18 = vld [vmem:[#allocation6 + $0x748] ss:$16 sps:$4 sm:$0xff]  }
  0xe5   :  { %1874 = vmatpush2.bf16.msra.mxu0 %v3262_v19  ;;  %v3360_v19 = vld [vmem:[#allocation6 + $0x52c] ss:$16 sps:$4 sm:$0xff]  }
  0xe6   :  { %1917 = vmatpush2.bf16.msra.mxu1 %v3265_v20  ;;  %1875 = vmatprep.subr.bf16.mxu0 %v3270_v23  ;;  %v3363_v20 = vld [vmem:[#allocation6 + $0x72c] ss:$16 sps:$4 sm:$0xff]   ;;  %v3358_v23 = vld [vmem:[#allocation6 + $0x528] ss:$16 sps:$4 sm:$0xff]  }
  0xe7   :  { %1918 = vmatprep.subr.bf16.mxu1 %v3273_v24  ;;  %v3361_v24 = vld [vmem:[#allocation6 + $0x728] ss:$16 sps:$4 sm:$0xff]  }
  0xe9   :  { %1876 = vmatpush2.bf16.msra.mxu0 %v3268_v25  ;;  %v3366_v25 = vld [vmem:[#allocation6 + $0x50c] ss:$16 sps:$4 sm:$0xff]  }
  0xea   :  { %1919 = vmatpush2.bf16.msra.mxu1 %v3271_v26  ;;  %1931 = vmatprep.subr.bf16.mxu0 %v3276_v27  ;;  %v3369_v26 = vld [vmem:[#allocation6 + $0x70c] ss:$16 sps:$4 sm:$0xff]   ;;  %v3364_v27 = vld [vmem:[#allocation6 + $0x508] ss:$16 sps:$4 sm:$0xff]  }
  0xeb   :  { %1974 = vmatprep.subr.bf16.mxu1 %v3279_v28  ;;  %v3367_v28 = vld [vmem:[#allocation6 + $0x708] ss:$16 sps:$4 sm:$0xff]  }
  0xec   :  { %1878 = vmatmul.mubr.bf16.vlgmr.msra.gmra.mxu0 %v3605_v9  ;;  %v3297_v9 = vld [vmem:[#allocation6 + $0x68c] ss:$16 sps:$4 sm:$0xff]  }
  0xed   :  { %1921 = vmatmul.mubr.bf16.vlgmr.msra.gmra.mxu1 %v3607_v10  ;;  %1932 = vmatpush1.bf16.msra.mxu0 %v3274_v29  ;;  %v3292_v10 = vld [vmem:[#allocation6 + $0x488] ss:$16 sps:$4 sm:$0xff]   ;;  %v3372_v29 = vld [vmem:[#allocation8 + $0x74] ss:$8 sps:$4 sm:$0xff]  }
  0xee   :  { %1975 = vmatpush1.bf16.msra.mxu1 %v3277_v30  ;;  %1933 = vmatprep.subr.bf16.mxu0 %v3282_v31  ;;  %v3370_v30 = vld [vmem:[#allocation8 + $0x70] ss:$8 sps:$4 sm:$0xff]   ;;  %v3375_v31 = vld [vmem:[#allocation8 + $0x64] ss:$8 sps:$4 sm:$0xff]  }
  0xef   :  { %1976 = vmatprep.subr.bf16.mxu1 %v3285_v32  ;;  %1963 = vmatprep.mubr.bf16.mxu0 %v3621_v42  ;;  %v3301_v42 = vld [vmem:[#allocation6 + $0x668] ss:$16 sps:$4 sm:$0xff]  }
  0xf0   :  { %2006 = vmatprep.mubr.bf16.mxu1 %v3625_v44  ;;  %v3306_v44 = vld [vmem:[#allocation6 + $0x44c] ss:$16 sps:$4 sm:$0xff]   ;;  %v3373_v32 = vld [vmem:[#allocation8 + $0x60] ss:$8 sps:$4 sm:$0xff]  }
  0xf1   :  { %1934 = vmatpush1.bf16.msra.mxu0 %v3280_v33  ;;  %v3378_v33 = vld [vmem:[#allocation8 + $0x54] ss:$8 sps:$4 sm:$0xff]  }
  0xf2   :  { %1977 = vmatpush1.bf16.msra.mxu1 %v3283_v34  ;;  %1935 = vmatprep.subr.bf16.mxu0 %v3288_v35  ;;  %v3376_v34 = vld [vmem:[#allocation8 + $0x50] ss:$8 sps:$4 sm:$0xff]   ;;  %v3381_v35 = vld [vmem:[#allocation8 + $0x44] ss:$8 sps:$4 sm:$0xff]  }
  0xf3   :  { %1978 = vmatprep.subr.bf16.mxu1 %v3291_v36  ;;  %v3418_v36 = vld [vmem:[#allocation8 + $0x170] ss:$8 sps:$4 sm:$0xff]  }
  0xf5   :  { %1936 = vmatpush1.bf16.msra.mxu0 %v3286_v37  ;;  %v3420_v37 = vld [vmem:[#allocation8 + $0x174] ss:$8 sps:$4 sm:$0xff]  }
  0xf6   :  { %1979 = vmatpush1.bf16.msra.mxu1 %v3289_v38  ;;  %1937 = vmatprep.subr.bf16.mxu0 %v3294_v39  ;;  %v3423_v38 = vld [vmem:[#allocation8 + $0x164] ss:$8 sps:$4 sm:$0xff]   ;;  %v3379_v39 = vld [vmem:[#allocation8 + $0x40] ss:$8 sps:$4 sm:$0xff]  }
  0xf7   :  { %1980 = vmatprep.subr.bf16.mxu1 %v3297_v9  ;;  %v3384_v9 = vld [vmem:[#allocation8 + $0x34] ss:$8 sps:$4 sm:$0xff]  }
  0xf9   :  { %1938 = vmatpush1.bf16.msra.mxu0 %v3292_v10  ;;  %v3382_v10 = vld [vmem:[#allocation8 + $0x30] ss:$8 sps:$4 sm:$0xff]  }
  0xfa   :  { %1981 = vmatpush1.bf16.msra.mxu1 %v3295_v54  ;;  %1939 = vmatprep.subr.bf16.mxu0 %v3300_v56  ;;  %v3387_v54 = vld [vmem:[#allocation8 + $0x24] ss:$8 sps:$4 sm:$0xff]   ;;  %v3424_v56 = vld [vmem:[#allocation8 + $0x150] ss:$8 sps:$4 sm:$0xff]  }
  0xfb   :  { %1982 = vmatprep.subr.bf16.mxu1 %v3303_v40  ;;  %v3429_v40 = vld [vmem:[#allocation8 + $0x144] ss:$8 sps:$4 sm:$0xff]  }
  0xfd   :  { %1940 = vmatpush1.bf16.msra.mxu0 %v3298_v41  ;;  %v3385_v41 = vld [vmem:[#allocation8 + $0x20] ss:$8 sps:$4 sm:$0xff]  }
  0xfe   :  { %1983 = vmatpush1.bf16.msra.mxu1 %v3301_v42  ;;  %1941 = vmatprep.subr.bf16.mxu0 %v3306_v44  ;;  %v3390_v42 = vld [vmem:[#allocation8 + $0x14] ss:$8 sps:$4 sm:$0xff]   ;;  %v3427_v44 = vld [vmem:[#allocation8 + $0x140] ss:$8 sps:$4 sm:$0xff]  }
  0xff   :  { %1984 = vmatprep.subr.bf16.mxu1 %v3309_v43  ;;  %v3432_v43 = vld [vmem:[#allocation8 + $0x134] ss:$8 sps:$4 sm:$0xff]  }
 0x101   :  { %1942 = vmatpush1.bf16.msra.mxu0 %v3304_v45  ;;  %v3388_v45 = vld [vmem:[#allocation8 + $0x10] ss:$8 sps:$4 sm:$0xff]  }
 0x102   :  { %1985 = vmatpush1.bf16.msra.mxu1 %v3307_v46  ;;  %1943 = vmatprep.subr.bf16.mxu0 %v3312_v47  ;;  %v3393_v46 = vld [vmem:[#allocation8 + $0x4] ss:$8 sps:$4 sm:$0xff]   ;;  %v3430_v47 = vld [vmem:[#allocation8 + $0x130] ss:$8 sps:$4 sm:$0xff]  }
 0x103   :  { %1986 = vmatprep.subr.bf16.mxu1 %v3315_v48  ;;  %v3435_v48 = vld [vmem:[#allocation8 + $0x124] ss:$8 sps:$4 sm:$0xff]  }
 0x105   :  { %1944 = vmatpush1.bf16.msra.mxu0 %v3310_v49  ;;  %v3391_v49 = vld [vmem:[#allocation8] ss:$8 sps:$4 sm:$0xff]  }
 0x106   :  { %1987 = vmatpush1.bf16.msra.mxu1 %v3313_v50  ;;  %1945 = vmatprep.subr.bf16.mxu0 %v3318_v51  ;;  %v3396_v50 = vld [vmem:[#allocation8 + $0xf4] ss:$8 sps:$4 sm:$0xff]   ;;  %v3433_v51 = vld [vmem:[#allocation8 + $0x120] ss:$8 sps:$4 sm:$0xff]  }
 0x107   :  { %1988 = vmatprep.subr.bf16.mxu1 %v3321_v52  ;;  %v3438_v52 = vld [vmem:[#allocation8 + $0x114] ss:$8 sps:$4 sm:$0xff]  }
 0x109   :  { %1946 = vmatpush1.bf16.msra.mxu0 %v3316_v53  ;;  %v3394_v53 = vld [vmem:[#allocation8 + $0xf0] ss:$8 sps:$4 sm:$0xff]  }
 0x10a   :  { %1989 = vmatpush1.bf16.msra.mxu1 %v3319_v55  ;;  %1947 = vmatprep.subr.bf16.mxu0 %v3324_v57  ;;  %v3399_v55 = vld [vmem:[#allocation8 + $0xe4] ss:$8 sps:$4 sm:$0xff]   ;;  %v3436_v57 = vld [vmem:[#allocation8 + $0x110] ss:$8 sps:$4 sm:$0xff]  }
 0x10b   :  { %1990 = vmatprep.subr.bf16.mxu1 %v3327_v58  ;;  %v3441_v58 = vld [vmem:[#allocation8 + $0x104] ss:$8 sps:$4 sm:$0xff]  }
 0x10d   :  { %1948 = vmatpush2.bf16.msra.mxu0 %v3322_v59  ;;  %v3397_v59 = vld [vmem:[#allocation8 + $0xe0] ss:$8 sps:$4 sm:$0xff]  }
 0x10e   :  { %1991 = vmatpush2.bf16.msra.mxu1 %v3325_v60  ;;  %1949 = vmatprep.subr.bf16.mxu0 %v3330_v61  ;;  %v3402_v60 = vld [vmem:[#allocation8 + $0xd4] ss:$8 sps:$4 sm:$0xff]   ;;  %v3439_v61 = vld [vmem:[#allocation8 + $0x100] ss:$8 sps:$4 sm:$0xff]  }
 0x10f   :  { %1992 = vmatprep.subr.bf16.mxu1 %v3333_v62  ;;  %v3444_v62 = vld [vmem:[#allocation8 + $0x1f4] ss:$8 sps:$4 sm:$0xff]  }
 0x111   :  { %1950 = vmatpush2.bf16.msra.mxu0 %v3328_v63  ;;  %v3400_v63 = vld [vmem:[#allocation8 + $0xd0] ss:$8 sps:$4 sm:$0xff]  }
 0x112   :  { %1993 = vmatpush2.bf16.msra.mxu1 %v3331_v0  ;;  %1951 = vmatprep.subr.bf16.mxu0 %v3336_v1  ;;  %v3405_v0 = vld [vmem:[#allocation8 + $0xc4] ss:$8 sps:$4 sm:$0xff]   ;;  %v3442_v1 = vld [vmem:[#allocation8 + $0x1f0] ss:$8 sps:$4 sm:$0xff]  }
 0x113   :  { %1994 = vmatprep.subr.bf16.mxu1 %v3339_v2  ;;  %v3447_v2 = vld [vmem:[#allocation8 + $0x1e4] ss:$8 sps:$4 sm:$0xff]  }
 0x115   :  { %1952 = vmatpush2.bf16.msra.mxu0 %v3334_v3  ;;  %v3403_v3 = vld [vmem:[#allocation8 + $0xc0] ss:$8 sps:$4 sm:$0xff]  }
 0x116   :  { %1995 = vmatpush2.bf16.msra.mxu1 %v3337_v4  ;;  %1953 = vmatprep.subr.bf16.mxu0 %v3342_v5  ;;  %v3408_v4 = vld [vmem:[#allocation8 + $0xb4] ss:$8 sps:$4 sm:$0xff]   ;;  %v3445_v5 = vld [vmem:[#allocation8 + $0x1e0] ss:$8 sps:$4 sm:$0xff]  }
 0x117   :  { %1996 = vmatprep.subr.bf16.mxu1 %v3345_v6  ;;  %v3450_v6 = vld [vmem:[#allocation8 + $0x1d4] ss:$8 sps:$4 sm:$0xff]  }
 0x119   :  { %1954 = vmatpush2.bf16.msra.mxu0 %v3340_v7  ;;  %v3406_v7 = vld [vmem:[#allocation8 + $0xb0] ss:$8 sps:$4 sm:$0xff]  }
 0x11a   :  { %1997 = vmatpush2.bf16.msra.mxu1 %v3343_v8  ;;  %1955 = vmatprep.subr.bf16.mxu0 %v3348_v11  ;;  %v3411_v8 = vld [vmem:[#allocation8 + $0xa4] ss:$8 sps:$4 sm:$0xff]   ;;  %v3448_v11 = vld [vmem:[#allocation8 + $0x1d0] ss:$8 sps:$4 sm:$0xff]  }
 0x11b   :  { %1998 = vmatprep.subr.bf16.mxu1 %v3351_v12  ;;  %v3453_v12 = vld [vmem:[#allocation8 + $0x1c4] ss:$8 sps:$4 sm:$0xff]  }
 0x11d   :  { %1956 = vmatpush2.bf16.msra.mxu0 %v3346_v13  ;;  %v3409_v13 = vld [vmem:[#allocation8 + $0xa0] ss:$8 sps:$4 sm:$0xff]  }
 0x11e   :  { %1999 = vmatpush2.bf16.msra.mxu1 %v3349_v14  ;;  %1957 = vmatprep.subr.bf16.mxu0 %v3354_v15 }
 0x11f   :  { %2000 = vmatprep.subr.bf16.mxu1 %v3357_v16  ;;  %v3414_v16 = vld [vmem:[#allocation8 + $0x94] ss:$8 sps:$4 sm:$0xff]  }
 0x121   :  { %1958 = vmatpush2.bf16.msra.mxu0 %v3352_v17  ;;  %v3451_v17 = vld [vmem:[#allocation8 + $0x1c0] ss:$8 sps:$4 sm:$0xff]  }
 0x122   :  { %2001 = vmatpush2.bf16.msra.mxu1 %v3355_v18  ;;  %1959 = vmatprep.subr.bf16.mxu0 %v3360_v19  ;;  %v3412_v18 = vld [vmem:[#allocation8 + $0x90] ss:$8 sps:$4 sm:$0xff]  }
 0x123   :  { %2002 = vmatprep.subr.bf16.mxu1 %v3363_v20 }
 0x125   :  { %1960 = vmatpush2.bf16.msra.mxu0 %v3358_v23  ;;  %v3417_v23 = vld [vmem:[#allocation8 + $0x84] ss:$8 sps:$4 sm:$0xff]  }
 0x126   :  { %2003 = vmatpush2.bf16.msra.mxu1 %v3361_v24  ;;  %1961 = vmatprep.subr.bf16.mxu0 %v3366_v25  ;;  %v2046_v24 = vlaneseq  ;;  %v3415_v25 = vld [vmem:[#allocation8 + $0x80] ss:$8 sps:$4 sm:$0xff]  }
 0x127   :  { %2004 = vmatprep.subr.bf16.mxu1 %v3369_v26 }
 0x129   :  { %1962 = vmatpush2.bf16.msra.mxu0 %v3364_v27 }
 0x12a   :  { %2005 = vmatpush2.bf16.msra.mxu1 %v3367_v28  ;;  %2498 = vmatprep.subr.bf16.mxu0 %v3372_v29  ;;  %v3647_v28 = vshrl.u32 %v2046_v24, 7 }
 0x12b   :  { %2541 = vmatprep.subr.bf16.mxu1 %v3420_v37 }
 0x12c   :  { %1964 = vmatmul.mubr.bf16.vlgmr.msra.gmra.mxu0 %v3631_v21  ;;  %v3421_v21 = vld [vmem:[#allocation8 + $0x160] ss:$8 sps:$4 sm:$0xff]   ;;  %v1707_v14 = vpop.f32.mrf.mxu0  ;;  %v3653_v37 = vsub.s32 0, %v3647_v28 }
 0x12d   :  { %2007 = vmatmul.mubr.bf16.vlgmr.msra.gmra.mxu1 %v3635_v22  ;;  %2499 = vmatpush1.bf16.msra.mxu0 %v3370_v30  ;;  %v3426_v22 = vld [vmem:[#allocation8 + $0x154] ss:$8 sps:$4 sm:$0xff]   ;;  %v1750_v15 = vpop.f32.mrf.mxu1 }
 0x12e   :  { %2500 = vmatprep.subr.bf16.mxu0 %v3375_v31  ;;  %2542 = vmatpush1.bf16.msra.mxu1 %v3418_v36  ;;  %v1709_v19 = vpop.f32.mrf.mxu0  ;;  %v1751_v31 = vadd.f32 %v1750_v15, %v1707_v14 }
 0x12f   :  { %2543 = vmatprep.subr.bf16.mxu1 %v3423_v38  ;;  %v1752_v20 = vpop.f32.mrf.mxu1  ;;  %v3658_v38 = vld [vmem:[%s3686_s2] sm:$0xf] }
 0x130   :  { %v1711_v26 = vpop.f32.mrf.mxu0 }
 0x131   :  { %2501 = vmatpush1.bf16.msra.mxu0 %v3373_v32  ;;  %v1754_v27 = vpop.f32.mrf.mxu1 }
 0x132   :  { %2502 = vmatprep.subr.bf16.mxu0 %v3378_v33  ;;  %2544 = vmatpush1.bf16.msra.mxu1 %v3421_v21  ;;  %v1713_v29 = vpop.f32.mrf.mxu0  ;;  %v3456_v21 = vld [vmem:[#allocation8 + $0x1b4] ss:$8 sps:$4 sm:$0xff]  }
 0x133   :  { %2545 = vmatprep.subr.bf16.mxu1 %v3426_v22  ;;  %v1756_v30 = vpop.f32.mrf.mxu1  ;;  %v1755_v22 = vadd.f32 %v1754_v27, %v1711_v26 }
 0x135   :  { %2503 = vmatpush1.bf16.msra.mxu0 %v3376_v34  ;;  %v3650_v34 = vsub.s32 1, %v3647_v28 }
 0x136   :  { %2504 = vmatprep.subr.bf16.mxu0 %v3381_v35  ;;  %2546 = vmatpush1.bf16.msra.mxu1 %v3424_v56  ;;  %v1753_v35 = vadd.f32 %v1752_v20, %v1709_v19 }
 0x137   :  { %2547 = vmatprep.subr.bf16.mxu1 %v3429_v40  ;;  %v2053_v56 = vrot.slane %v3658_v38, %v3650_v34 }
 0x139   :  { %2505 = vmatpush1.bf16.msra.mxu0 %v3379_v39 }
 0x13a   :  { %2506 = vmatprep.subr.bf16.mxu0 %v3384_v9  ;;  %2548 = vmatpush1.bf16.msra.mxu1 %v3427_v44 }
 0x13b   :  { %2549 = vmatprep.subr.bf16.mxu1 %v3432_v43 }
 0x13d   :  { %2507 = vmatpush1.bf16.msra.mxu0 %v3382_v10 }
 0x13e   :  { %2508 = vmatprep.subr.bf16.mxu0 %v3387_v54  ;;  %2550 = vmatpush1.bf16.msra.mxu1 %v3430_v47  ;;  %v3454_v54 = vld [vmem:[#allocation8 + $0x1b0] ss:$8 sps:$4 sm:$0xff]  }
 0x13f   :  { %2551 = vmatprep.subr.bf16.mxu1 %v3435_v48  ;;  %v3459_v48 = vld [vmem:[#allocation8 + $0x1a4] ss:$8 sps:$4 sm:$0xff]  }
 0x141   :  { %2509 = vmatpush1.bf16.msra.mxu0 %v3385_v41 }
 0x142   :  { %2510 = vmatprep.subr.bf16.mxu0 %v3390_v42  ;;  %2552 = vmatpush1.bf16.msra.mxu1 %v3433_v51  ;;  %v2049_v42 = vrot.slane %v3658_v38, %v3653_v37 }
 0x143   :  { %2553 = vmatprep.subr.bf16.mxu1 %v3438_v52 }
 0x145   :  { %2511 = vmatpush1.bf16.msra.mxu0 %v3388_v45 }
 0x146   :  { %2512 = vmatprep.subr.bf16.mxu0 %v3393_v46  ;;  %2554 = vmatpush1.bf16.msra.mxu1 %v3436_v57  ;;  %v1757_v46 = vadd.f32 %v1756_v30, %v1713_v29  ;;  %v2056_v29 = vsub.s32 2, %v3647_v28 }
 0x147   :  { %2555 = vmatprep.subr.bf16.mxu1 %v3441_v58 }
 0x149   :  { %2513 = vmatpush1.bf16.msra.mxu0 %v3391_v49 }
 0x14a   :  { %2514 = vmatprep.subr.bf16.mxu0 %v3396_v50  ;;  %2556 = vmatpush1.bf16.msra.mxu1 %v3439_v61  ;;  %v3457_v50 = vld [vmem:[#allocation8 + $0x1a0] ss:$8 sps:$4 sm:$0xff]   ;;  %v3460_v61 = vld [vmem:[#allocation8 + $0x190] ss:$8 sps:$4 sm:$0xff]  }
 0x14b   :  { %2557 = vmatprep.subr.bf16.mxu1 %v3444_v62 }
 0x14d   :  { %2515 = vmatpush2.bf16.msra.mxu0 %v3394_v53 }
 0x14e   :  { %2516 = vmatprep.subr.bf16.mxu0 %v3399_v55  ;;  %2558 = vmatpush2.bf16.msra.mxu1 %v3442_v1 }
 0x14f   :  { %2559 = vmatprep.subr.bf16.mxu1 %v3447_v2  ;;  %v3463_v2 = vld [vmem:[#allocation8 + $0x180] ss:$8 sps:$4 sm:$0xff]  }
 0x151   :  { %2517 = vmatpush2.bf16.msra.mxu0 %v3397_v59  ;;  %v3462_v59 = vld [vmem:[#allocation8 + $0x194] ss:$8 sps:$4 sm:$0xff]  }
 0x152   :  { %2518 = vmatprep.subr.bf16.mxu0 %v3402_v60  ;;  %2560 = vmatpush2.bf16.msra.mxu1 %v3445_v5 }
 0x153   :  { %2561 = vmatprep.subr.bf16.mxu1 %v3450_v6 }
 0x155   :  { %2519 = vmatpush2.bf16.msra.mxu0 %v3400_v63 }
 0x156   :  { %2520 = vmatprep.subr.bf16.mxu0 %v3405_v0  ;;  %2562 = vmatpush2.bf16.msra.mxu1 %v3448_v11 }
 0x157   :  { %2563 = vmatprep.subr.bf16.mxu1 %v3453_v12 }
 0x159   :  { %2521 = vmatpush2.bf16.msra.mxu0 %v3403_v3 }
 0x15a   :  { %2522 = vmatprep.subr.bf16.mxu0 %v3408_v4  ;;  %2564 = vmatpush2.bf16.msra.mxu1 %v3451_v17  ;;  %v3465_v4 = vld [vmem:[#allocation8 + $0x184] ss:$8 sps:$4 sm:$0xff]  }
 0x15b   :  { %2565 = vmatprep.subr.bf16.mxu1 %v3456_v21 }
 0x15d   :  { %2523 = vmatpush2.bf16.msra.mxu0 %v3406_v7 }
 0x15e   :  { %2524 = vmatprep.subr.bf16.mxu0 %v3411_v8  ;;  %2566 = vmatpush2.bf16.msra.mxu1 %v3454_v54 }
 0x15f   :  { %2567 = vmatprep.subr.bf16.mxu1 %v3459_v48 }
 0x161   :  { %2525 = vmatpush2.bf16.msra.mxu0 %v3409_v13 }
 0x162   :  { %2526 = vmatprep.subr.bf16.mxu0 %v3414_v16  ;;  %2568 = vmatpush2.bf16.msra.mxu1 %v3457_v50 }
 0x163   :  { %2569 = vmatprep.subr.bf16.mxu1 %v3462_v59  ;;  %v2166_v59 = vld [vmem:[%s3688_s4] sm:$0x3] }
 0x165   :  { %2527 = vmatpush2.bf16.msra.mxu0 %v3412_v18 }
 0x166   :  { %2528 = vmatprep.subr.bf16.mxu0 %v3417_v23  ;;  %2570 = vmatpush2.bf16.msra.mxu1 %v3460_v61  ;;  %v2171_v61 = vrot.slane %v2166_v59, %v3653_v37 }
 0x167   :  { %2571 = vmatprep.subr.bf16.mxu1 %v3465_v4 }
 0x169   :  { %2529 = vmatpush2.bf16.msra.mxu0 %v3415_v25  ;;  %v2060_v25 = vsub.s32 3, %v3647_v28 }
 0x16a   :  { %2572 = vmatpush2.bf16.msra.mxu1 %v3463_v2 }
 0x16c   :  { %v1793_v32 = vpop.f32.mrf.mxu0 }
 0x16d   :  { %v1836_v33 = vpop.f32.mrf.mxu1  ;;  %v1794_v36 = vadd.f32 %v1793_v32, %v1751_v31 }
 0x16e   :  { %v1795_v39 = vpop.f32.mrf.mxu0 }
 0x16f   :  { %v1838_v9 = vpop.f32.mrf.mxu1  ;;  %v1796_v10 = vadd.f32 %v1795_v39, %v1753_v35  ;;  %v1837_v41 = vadd.f32 %v1836_v33, %v1794_v36  ;;  %v2061_v35 = vrot.slane %v3658_v38, %v2060_v25 }
 0x170   :  { %v1797_v40 = vpop.f32.mrf.mxu0 }
 0x171   :  { %v1839_v44 = vadd.f32 %v1838_v9, %v1796_v10  ;;  %v1798_v43 = vadd.f32 %v1797_v40, %v1755_v22  ;;  %v1840_v45 = vpop.f32.mrf.mxu1  ;;  %v2066_v53 = vadd.f32 %v2049_v42, %v1837_v41  ;;  %v2057_v9 = vrot.slane %v3658_v38, %v2056_v29 }
 0x172   :  { %v1799_v47 = vpop.f32.mrf.mxu0 }
 0x173   :  { %v1841_v49 = vadd.f32 %v1840_v45, %v1798_v43  ;;  %v2067_v51 = vadd.f32 %v2053_v56, %v1839_v44  ;;  %v1800_v52 = vadd.f32 %v1799_v47, %v1757_v46  ;;  %v1842_v57 = vpop.f32.mrf.mxu1  ;;  %v2082_v0 = vmul.f32 0.2, %v2066_v53 }
 0x174   :  { %vm2074_vm2 = vcmp.gt.f32.partialorder %v2066_v53, 0.0 }
 0x175   :  { %v2070_v55 = vadd.f32 %v2049_v42, %v1841_v49  ;;  %v1843_v58 = vadd.f32 %v1842_v57, %v1800_v52  ;;  %v2083_v62 = vmul.f32 0.2, %v2067_v51  ;;  %vm2075_vm1 = vcmp.gt.f32.partialorder %v2067_v51, 0.0 }
 0x176   :  { %v2090_v7 = vsel %vm2074_vm2, %v2066_v53, %v2082_v0 }
 0x177   :  { %v2086_v60 = vmul.f32 0.2, %v2070_v55  ;;  %vm2078_vm0 = vcmp.gt.f32.partialorder %v2070_v55, 0.0  ;;  %v2071_v63 = vadd.f32 %v2053_v56, %v1843_v58  ;;  %v2091_v5 = vsel %vm2075_vm1, %v2067_v51, %v2083_v62 }
 0x178   :  { %v2175_v62 = vrot.slane %v2166_v59, %v3650_v34 }
 0x179   :  { %vm2079_vm3 = vcmp.gt.f32.partialorder %v2071_v63, 0.0  ;;  %v2087_v1 = vmul.f32 0.2, %v2071_v63  ;;  %v2094_v3 = vsel %vm2078_vm0, %v2070_v55, %v2086_v60 }
 0x17a   :  { %v2098_v11 = vpack.c.bf16 %v2094_v3, %v2090_v7 }
 0x17b   :  { %v2095_v6 = vsel %vm2079_vm3, %v2071_v63, %v2087_v1 }
 0x17c   :  { %v2099_v8 = vpack.c.bf16 %v2095_v6, %v2091_v5  ;;  %v2596_v5 = vld [vmem:[%s3689_s5] sm:$0x3] }
 0x17e   :  { %2530 = vmatprep.mubr.bf16.mxu0 %v2099_v8 }
 0x17f   :  { %2531 = vmatmul.mubr.bf16.vlgmr.msra.gmra.mxu0 %v2098_v11 }
 0x1ac   :  { %v1879_v12 = vpop.f32.mrf.mxu0 }
 0x1ad   :  { %v1922_v13 = vpop.f32.mrf.mxu1 }
 0x1ae   :  { %v1881_v14 = vpop.f32.mrf.mxu0  ;;  %v1923_v20 = vadd.f32 %v1922_v13, %v1879_v12 }
 0x1af   :  { %v1924_v15 = vpop.f32.mrf.mxu1 }
 0x1b0   :  { %v1883_v16 = vpop.f32.mrf.mxu0  ;;  %v1925_v26 = vadd.f32 %v1924_v15, %v1881_v14  ;;  %v2601_v14 = vrot.slane %v2596_v5, %v3653_v37  ;;  %v2605_v15 = vrot.slane %v2596_v5, %v3650_v34 }
 0x1b1   :  { %v1926_v17 = vpop.f32.mrf.mxu1 }
 0x1b2   :  { %v1885_v18 = vpop.f32.mrf.mxu0  ;;  %v1927_v32 = vadd.f32 %v1926_v17, %v1883_v16 }
 0x1b3   :  { %v1928_v19 = vpop.f32.mrf.mxu1 }
 0x1b4   :  { %v1929_v54 = vadd.f32 %v1928_v19, %v1885_v18 }
 0x1ec   :  { %v1965_v23 = vpop.f32.mrf.mxu0 }
 0x1ed   :  { %v2008_v24 = vpop.f32.mrf.mxu1  ;;  %v1966_v27 = vadd.f32 %v1965_v23, %v1923_v20 }
 0x1ee   :  { %v1967_v30 = vpop.f32.mrf.mxu0 }
 0x1ef   :  { %v2010_v31 = vpop.f32.mrf.mxu1  ;;  %v1968_v33 = vadd.f32 %v1967_v30, %v1925_v26  ;;  %v2009_v39 = vadd.f32 %v2008_v24, %v1966_v27 }
 0x1f0   :  { %v1969_v36 = vpop.f32.mrf.mxu0 }
 0x1f1   :  { %v2011_v21 = vadd.f32 %v2010_v31, %v1968_v33  ;;  %v1970_v22 = vadd.f32 %v1969_v36, %v1927_v32  ;;  %v2012_v10 = vpop.f32.mrf.mxu1  ;;  %v2068_v44 = vadd.f32 %v2057_v9, %v2009_v39  ;;  %v2976_v33 = vld [vmem:[#allocation3] ss:$0 sm:$0xff] }
 0x1f2   :  { %v1971_v56 = vpop.f32.mrf.mxu0 }
 0x1f3   :  { %v2013_v40 = vadd.f32 %v2012_v10, %v1970_v22  ;;  %v2069_v41 = vadd.f32 %v2061_v35, %v2011_v21  ;;  %v1972_v42 = vadd.f32 %v1971_v56, %v1929_v54  ;;  %v2014_v43 = vpop.f32.mrf.mxu1  ;;  %v2084_v49 = vmul.f32 0.2, %v2068_v44 }
 0x1f4   :  { %vm2076_vm6 = vcmp.gt.f32.partialorder %v2068_v44, 0.0 }
 0x1f5   :  { %v2072_v28 = vadd.f32 %v2057_v9, %v2013_v40  ;;  %v2015_v45 = vadd.f32 %v2014_v43, %v1972_v42  ;;  %v2085_v47 = vmul.f32 0.2, %v2069_v41  ;;  %vm2077_vm5 = vcmp.gt.f32.partialorder %v2069_v41, 0.0 }
 0x1f6   :  { %v2092_v53 = vsel %vm2076_vm6, %v2068_v44, %v2084_v49 }
 0x1f7   :  { %v2088_v46 = vmul.f32 0.2, %v2072_v28  ;;  %vm2080_vm4 = vcmp.gt.f32.partialorder %v2072_v28, 0.0  ;;  %v2073_v48 = vadd.f32 %v2061_v35, %v2015_v45  ;;  %v2093_v51 = vsel %vm2077_vm5, %v2069_v41, %v2085_v47 }
 0x1f9   :  { %vm2081_vm7 = vcmp.gt.f32.partialorder %v2073_v48, 0.0  ;;  %v2089_v38 = vmul.f32 0.2, %v2073_v48  ;;  %v2096_v50 = vsel %vm2080_vm4, %v2072_v28, %v2088_v46 }
 0x1fa   :  { %v2100_v57 = vpack.c.bf16 %v2096_v50, %v2092_v53 }
 0x1fb   :  { %v2097_v52 = vsel %vm2081_vm7, %v2073_v48, %v2089_v38 }
 0x1fc   :  { %v2101_v55 = vpack.c.bf16 %v2097_v52, %v2093_v51 }
 0x1fe   :  { %2573 = vmatprep.mubr.bf16.mxu1 %v2101_v55 }
 0x1ff   :  { %2574 = vmatmul.mubr.bf16.vlgmr.msra.gmra.mxu1 %v2100_v57 }
 0x23f   :  { %v2532_v58 = vpop.f32.mrf.mxu0 }
 0x240   :  { %v2533_v0 = vadd.f32 %v2532_v58, %v2171_v61 }
 0x241   :  { %v2534_v60 = vpop.f32.mrf.mxu0 }
 0x242   :  { %v2535_v2 = vadd.f32 %v2534_v60, %v2175_v62 }
 0x243   :  { %v2536_v63 = vpop.f32.mrf.mxu0 }
 0x244   :  { %v2537_v7 = vadd.f32 %v2536_v63, %v2171_v61 }
 0x245   :  { %v2538_v3 = vpop.f32.mrf.mxu0 }
 0x246   :  { %v2539_v12 = vadd.f32 %v2538_v3, %v2175_v62 }
 0x2bf   :  { %v2575_v1 = vpop.f32.mrf.mxu1 }
 0x2c0   :  { %v2576_v4 = vadd.f32 %v2575_v1, %v2533_v0 }
 0x2c1   :  { %v2577_v6 = vpop.f32.mrf.mxu1 }
 0x2c2   :  { %vm2584_vm8 = vcmp.gt.f32.partialorder %v2576_v4, 0.0  ;;  %v2588_v8 = vmul.f32 0.2, %v2576_v4  ;;  %v2578_v11 = vadd.f32 %v2577_v6, %v2535_v2 }
 0x2c3   :  { %v2579_v13 = vpop.f32.mrf.mxu1 }
 0x2c4   :  { %vm2585_vm9 = vcmp.gt.f32.partialorder %v2578_v11, 0.0  ;;  %v2589_v16 = vmul.f32 0.2, %v2578_v11  ;;  %v2580_v17 = vadd.f32 %v2579_v13, %v2537_v7  ;;  %v2592_v18 = vsel %vm2584_vm8, %v2576_v4, %v2588_v8 }
 0x2c5   :  { %v2581_v19 = vpop.f32.mrf.mxu1  ;;  %v2608_v25 = vmul.f32 %v2601_v14, %v2592_v18 }
 0x2c6   :  { %vm2586_vm10 = vcmp.gt.f32.partialorder %v2580_v17, 0.0  ;;  %v2590_v20 = vmul.f32 0.2, %v2580_v17  ;;  %v2582_v23 = vadd.f32 %v2581_v19, %v2539_v12  ;;  %v2593_v24 = vsel %vm2585_vm9, %v2578_v11, %v2589_v16 }
 0x2c7   :  { %v2609_v26 = vmul.f32 %v2605_v15, %v2593_v24 }
 0x2c8   :  { %vm2587_vm11 = vcmp.gt.f32.partialorder %v2582_v23, 0.0  ;;  %v2591_v27 = vmul.f32 0.2, %v2582_v23  ;;  %v2594_v29 = vsel %vm2586_vm10, %v2580_v17, %v2590_v20 }
 0x2c9   :  { %v2612_v30 = vadd.f32 %v2609_v26, %v2608_v25  ;;  %v2610_v37 = vmul.f32 %v2601_v14, %v2594_v29 }
 0x2ca   :  { %v2595_v31 = vsel %vm2587_vm11, %v2582_v23, %v2591_v27 }
 0x2cb   :  { %2613 = vadd.xlane.f32.xlu0 %v2612_v30  ;;  %v2611_v32 = vmul.f32 %v2605_v15, %v2595_v31 }
 0x2cd   :  { %v2615_v34 = vadd.f32 %v2611_v32, %v2610_v37 }
 0x2cf   :  { %2616 = vadd.xlane.f32.xlu0 %v2615_v34 }
 0x354   :  { %v2614_v35 = vpop.xlane.xlu0 %2613 }
 0x355   :  { %v2625_v36 = vadd.f32 %v2976_v33, %v2614_v35 }
 0x357   :  { %v2627_v39 = vsub.f32 0.0, %v2625_v36 }
 0x358   :  { %v2617_v9 = vpop.xlane.xlu0 %2616 }
 0x359   :  { %v2629_v21 = vmul.f32 1.442695, %v2627_v39  ;;  %v2626_v22 = vadd.f32 %v2976_v33, %v2617_v9 }
 0x35b   :  { %3466 = vpow2.f32 %v2629_v21  ;;  %v2628_v10 = vsub.f32 0.0, %v2626_v22 }
 0x35d   :  { %v2631_v54 = vmul.f32 1.442695, %v2628_v10 }
 0x35f   :  { %3468 = vpow2.f32 %v2631_v54 }
 0x368   :  { %v3467_v56 = vpop.eup %3466 }
 0x369   :  { %v2633_v40 = vadd.f32 1.0, %v3467_v56 }
 0x36b   :  { %3470 = vrcp.f32 %v2633_v40 }
 0x36c   :  { %v3469_v41 = vpop.eup %3468 }
 0x36d   :  { %v2634_v42 = vadd.f32 1.0, %v3469_v41 }
 0x36f   :  { %3472 = vrcp.f32 %v2634_v42 }
 0x378   :  { %v3471_v44 = vpop.eup %3470 }
 0x379   :  { %2640 = vst.msk [vmem:[%s3691_s7] sm:$0xff] %vm2639_vm12, %v3471_v44 }
 0x37c   :  { %v3473_v28 = vpop.eup %3472 }
 0x37d   :  { %2641 = vst.msk [vmem:[%s3691_s7 + $0x8] sm:$0xff] %vm2639_vm12, %v3473_v28 }
 0x37e   :  { %2646 = vsyncpa [#allocation5], 1 }
 0x37f   :  { %2647 = vsyncpa [#allocation7], 1 }

</bundles_post_ra>
